<compile_context>
chip_gen: v7x
topology: tpu7x:2x2x1
jax: 0.10.0
libtpu: 0.0.40
codegen_flags: <defaults>
</compile_context>

<pallas_src>
import functools

import jax
import jax.numpy as jnp
from jax.experimental import pallas as pl
from jax.experimental.pallas import tpu as pltpu


GATE_STRIDE = 128   # padded hidden width == per-gate lane stride (one lane tile)
FC_PAD = 128        # fc1 width padded 32 -> 128
C_PAD = 128         # fc2 output padded num_classes -> 128 (lane-dense store)


def _gru_classifier_kernel(
    x_ref,                 # (T*B, D+1)  bf16, time-major rows, last col == 1.0
    wi_ref,                # (D+1, 3*GS) bf16, packed [r|z|n]; last row = folded gate bias
    wh_ref,                # (GS, 3*GS)  bf16, packed [r|z|n]; rows H..GS-1 are zero
    bhn_ref,               # (1, GS)     f32,  hidden bias of n gate (lanes H.. zero)
    fc1w_ref, fc1b_ref,    # (GS, FCP) bf16 / (1, FCP) f32   (zero padded)
    fc2w_ref, fc2b_ref,    # (FCP, CP) bf16 / (1, CP)  f32   (zero padded)
    out_ref,               # (B, CP)     f32
    *, T, B,
):
    GS = wh_ref.shape[0]

    # --- fused input projection (independent of h => off the serial path) ---
    # one (T*B, D+1) @ (D+1, 3*GS) matmul; folded gate biases ride on the ones
    # column, so no broadcast/add is needed.
    xproj_all = jnp.dot(x_ref[...], wi_ref[...],
                        preferred_element_type=jnp.float32)        # (T*B, 3*GS) f32
    xps = [xproj_all[t * B:(t + 1) * B, :] for t in range(T)]

    wh = wh_ref[...]                                               # bf16, kept live
    bhn = jnp.broadcast_to(bhn_ref[...], (B, GS))                  # broadcast once

    # --- GRU recurrence, fully unrolled (T is a small static constant) ------
    # h lives at full 128-lane width; padded lanes stay exactly 0 (zero weight
    # rows/cols), so no narrow slices are needed on the critical path.
    h = jnp.zeros((B, GS), jnp.float32)
    for t in range(T):
        hW = jnp.dot(h.astype(jnp.bfloat16), wh,
                     preferred_element_type=jnp.float32)           # (B, 3*GS) f32
        xp = xps[t]
        r = jax.nn.sigmoid(xp[:, 0 * GS:1 * GS] + hW[:, 0 * GS:1 * GS])
        z = jax.nn.sigmoid(xp[:, 1 * GS:2 * GS] + hW[:, 1 * GS:2 * GS])
        n = jnp.tanh(xp[:, 2 * GS:3 * GS] + r * (hW[:, 2 * GS:3 * GS] + bhn))
        h = n + z * (h - n)                         # == (1 - z) * n + z * h

    # --- classifier head (dropout == identity in eval mode) -----------------
    y1 = jnp.maximum(
        jnp.dot(h.astype(jnp.bfloat16), fc1w_ref[...],
                preferred_element_type=jnp.float32) + fc1b_ref[...], 0.0)
    out_ref[...] = (
        jnp.dot(y1.astype(jnp.bfloat16), fc2w_ref[...],
                preferred_element_type=jnp.float32) + fc2b_ref[...])


def prepare_params(params):
    """One-time parameter fusion: gate packing, zero padding, bias folding,
    bf16 casts. Call once at model load, NOT per forward."""
    D, H = params["wir"].shape
    FC = params["fc1w"].shape[1]
    C = params["fc2w"].shape[1]
    GS = GATE_STRIDE
    assert H <= GS and FC <= FC_PAD and C <= C_PAD

    wi = jnp.zeros((D + 1, 3 * GS), jnp.float32)    # last row carries folded bias
    wh = jnp.zeros((GS, 3 * GS), jnp.float32)
    gates = [
        (params["wir"], params["whr"], params["bir"] + params["bhr"]),
        (params["wiz"], params["whz"], params["biz"] + params["bhz"]),
        (params["win"], params["whn"], params["bin"]),
    ]
    for g, (wig, whg, bgg) in enumerate(gates):
        wi = wi.at[:D, g * GS:g * GS + H].set(wig)
        wi = wi.at[D:, g * GS:g * GS + H].set(bgg)
        wh = wh.at[:H, g * GS:g * GS + H].set(whg)

    bhn = jnp.zeros((1, GS), jnp.float32).at[:, :H].set(params["bhn"])
    fc1w = jnp.zeros((GS, FC_PAD), jnp.float32).at[:H, :FC].set(params["fc1w"])
    fc1b = jnp.zeros((1, FC_PAD), jnp.float32).at[:, :FC].set(params["fc1b"])
    fc2w = jnp.zeros((FC_PAD, C_PAD), jnp.float32).at[:FC, :C].set(params["fc2w"])
    fc2b = jnp.zeros((1, C_PAD), jnp.float32).at[:, :C].set(params["fc2b"])

    return dict(
        wi=wi.astype(jnp.bfloat16),
        wh=wh.astype(jnp.bfloat16),
        bhn=bhn,
        fc1w=fc1w.astype(jnp.bfloat16),
        fc1b=fc1b,
        fc2w=fc2w.astype(jnp.bfloat16),
        fc2b=fc2b,
        num_classes=C,
    )


def make_forward(fused):
    """Build a jitted forward fn closing over the prebuilt fused parameters."""
    C = int(fused["num_classes"])
    vmem = pl.BlockSpec(memory_space=pltpu.MemorySpace.VMEM)

    @jax.jit
    def forward(x):
        B, T, D = x.shape
        # Time-major flatten + ones column (carries the folded gate bias row).
        x_tb = jnp.transpose(x, (1, 0, 2)).reshape(T * B, D)
        x_aug = jnp.concatenate(
            [x_tb, jnp.ones((T * B, 1), x_tb.dtype)], axis=1).astype(jnp.bfloat16)

        out_pad = pl.pallas_call(
            functools.partial(_gru_classifier_kernel, T=T, B=B),
            out_shape=jax.ShapeDtypeStruct((B, C_PAD), jnp.float32),
            in_specs=[vmem] * 8,
            out_specs=vmem,
        )(x_aug, fused["wi"], fused["wh"], fused["bhn"],
          fused["fc1w"], fused["fc1b"], fused["fc2w"], fused["fc2b"])
        return out_pad[:, :C]

    return forward


def make_params(key, input_dim, hidden_dim, fc_dim, output_dim):
    """Deterministic init mimicking PyTorch default uniform(-k, k) inits."""
    ks = jax.random.split(key, 16)
    kg = 1.0 / jnp.sqrt(hidden_dim)
    k1 = 1.0 / jnp.sqrt(hidden_dim)
    k2 = 1.0 / jnp.sqrt(fc_dim)

    def u(k, shape, scale):
        return jax.random.uniform(k, shape, jnp.float32, -scale, scale)

    return dict(
        # GRU weights stored pre-transposed for x @ W and h @ W in the kernel.
        wir=u(ks[0], (input_dim, hidden_dim), kg),
        wiz=u(ks[1], (input_dim, hidden_dim), kg),
        win=u(ks[2], (input_dim, hidden_dim), kg),
        whr=u(ks[3], (hidden_dim, hidden_dim), kg),
        whz=u(ks[4], (hidden_dim, hidden_dim), kg),
        whn=u(ks[5], (hidden_dim, hidden_dim), kg),
        bir=u(ks[6], (1, hidden_dim), kg),
        biz=u(ks[7], (1, hidden_dim), kg),
        bin=u(ks[8], (1, hidden_dim), kg),
        bhr=u(ks[9], (1, hidden_dim), kg),
        bhz=u(ks[10], (1, hidden_dim), kg),
        bhn=u(ks[11], (1, hidden_dim), kg),
        fc1w=u(ks[12], (hidden_dim, fc_dim), k1),
        fc1b=u(ks[13], (1, fc_dim), k1),
        fc2w=u(ks[14], (fc_dim, output_dim), k2),
        fc2b=u(ks[15], (1, output_dim), k2),
    )


def reference_forward(x, p):
    """Pure-JAX f32 reference (same math as torch.nn.GRU + fc head, eval mode)."""
    B, T, D = x.shape
    H = p["whr"].shape[0]
    h = jnp.zeros((B, H), jnp.float32)
    for t in range(T):
        xt = x[:, t, :]
        r = jax.nn.sigmoid(xt @ p["wir"] + p["bir"] + h @ p["whr"] + p["bhr"])
        z = jax.nn.sigmoid(xt @ p["wiz"] + p["biz"] + h @ p["whz"] + p["bhz"])
        n = jnp.tanh(xt @ p["win"] + p["bin"] + r * (h @ p["whn"] + p["bhn"]))
        h = (1.0 - z) * n + z * h
    y1 = jnp.maximum(h @ p["fc1w"] + p["fc1b"], 0.0)
    return y1 @ p["fc2w"] + p["fc2b"]


if __name__ == "__main__":
    # Small shapes consistent with the module: batch=2, seq=8,
    # FEATURE_DIM=16 (input_dim), hidden_dim=64, fc=32, num_classes=18.
    B, T, D, H, FC, C = 2, 8, 16, 64, 32, 18

    key = jax.random.PRNGKey(0)
    kx, kp = jax.random.split(key)
    x = jax.random.normal(kx, (B, T, D), jnp.float32)
    params = make_params(kp, D, H, FC, C)

    fused = prepare_params(params)     # one-time fusion, off the per-call path
    forward = make_forward(fused)

    out = jax.block_until_ready(forward(x))
    ref = reference_forward(x, params)

    assert out.shape == (B, C), out.shape
    # bf16 MXU operands => expect ~1e-2 level deltas vs the pure-f32 reference.
    err = float(jnp.max(jnp.abs(out - ref)))
    assert err < 5e-2, f"mismatch vs pure-JAX reference: {err}"
    print("KERNEL_OK")
</pallas_src>

<mosaic_0001>
module attributes {stable_mosaic.version = 11 : i64} {
  func.func @_gru_classifier_kernel(%arg0: memref<16x17xbf16, #tpu.memory_space<vmem>>, %arg1: memref<17x384xbf16, #tpu.memory_space<vmem>>, %arg2: memref<128x384xbf16, #tpu.memory_space<vmem>>, %arg3: memref<1x128xf32, #tpu.memory_space<vmem>>, %arg4: memref<128x128xbf16, #tpu.memory_space<vmem>>, %arg5: memref<1x128xf32, #tpu.memory_space<vmem>>, %arg6: memref<128x128xbf16, #tpu.memory_space<vmem>>, %arg7: memref<1x128xf32, #tpu.memory_space<vmem>>, %arg8: memref<2x128xf32, #tpu.memory_space<vmem>>) attributes {dimension_semantics = [], scalar_prefetch = 0 : i64, scratch_operands = 0 : i64, tpu.core_type = #tpu.core_type<tc>} {
    %c0 = arith.constant 0 : index
    %c0_0 = arith.constant 0 : index
    %0 = vector.load %arg0[%c0, %c0_0] : memref<16x17xbf16, #tpu.memory_space<vmem>>, vector<16x17xbf16>
    %c0_1 = arith.constant 0 : index
    %c0_2 = arith.constant 0 : index
    %1 = vector.load %arg1[%c0_1, %c0_2] : memref<17x384xbf16, #tpu.memory_space<vmem>>, vector<17x384xbf16>
    %cst = arith.constant dense<0.000000e+00> : vector<16x384xf32>
    %2 = tpu.matmul %0, %1, %cst {dimension_numbers = #tpu.dot_dimension_numbers<[1], [0], [0], [1], [0, 0, 1, 1], [], []>} : vector<16x17xbf16>, vector<17x384xbf16>, vector<16x384xf32> -> vector<16x384xf32>
    %3 = vector.extract_strided_slice %2 {offsets = [0, 0], sizes = [2, 384], strides = [1, 1]} : vector<16x384xf32> to vector<2x384xf32>
    %4 = vector.extract_strided_slice %2 {offsets = [2, 0], sizes = [2, 384], strides = [1, 1]} : vector<16x384xf32> to vector<2x384xf32>
    %5 = vector.extract_strided_slice %2 {offsets = [4, 0], sizes = [2, 384], strides = [1, 1]} : vector<16x384xf32> to vector<2x384xf32>
    %6 = vector.extract_strided_slice %2 {offsets = [6, 0], sizes = [2, 384], strides = [1, 1]} : vector<16x384xf32> to vector<2x384xf32>
    %7 = vector.extract_strided_slice %2 {offsets = [8, 0], sizes = [2, 384], strides = [1, 1]} : vector<16x384xf32> to vector<2x384xf32>
    %8 = vector.extract_strided_slice %2 {offsets = [10, 0], sizes = [2, 384], strides = [1, 1]} : vector<16x384xf32> to vector<2x384xf32>
    %9 = vector.extract_strided_slice %2 {offsets = [12, 0], sizes = [2, 384], strides = [1, 1]} : vector<16x384xf32> to vector<2x384xf32>
    %10 = vector.extract_strided_slice %2 {offsets = [14, 0], sizes = [2, 384], strides = [1, 1]} : vector<16x384xf32> to vector<2x384xf32>
    %c0_3 = arith.constant 0 : index
    %c0_4 = arith.constant 0 : index
    %11 = vector.load %arg2[%c0_3, %c0_4] : memref<128x384xbf16, #tpu.memory_space<vmem>>, vector<128x384xbf16>
    %c0_5 = arith.constant 0 : index
    %c0_6 = arith.constant 0 : index
    %12 = vector.load %arg3[%c0_5, %c0_6] : memref<1x128xf32, #tpu.memory_space<vmem>>, vector<1x128xf32>
    %13 = vector.shape_cast %12 : vector<1x128xf32> to vector<1x128xf32>
    %14 = vector.broadcast %13 : vector<1x128xf32> to vector<2x128xf32>
    %cst_7 = arith.constant 0.000000e+00 : f32
    %15 = vector.broadcast %cst_7 : f32 to vector<2x128xf32>
    %16 = arith.truncf %15 : vector<2x128xf32> to vector<2x128xbf16>
    %cst_8 = arith.constant dense<0.000000e+00> : vector<2x384xf32>
    %17 = tpu.matmul %16, %11, %cst_8 {dimension_numbers = #tpu.dot_dimension_numbers<[1], [0], [0], [1], [0, 0, 1, 1], [], []>} : vector<2x128xbf16>, vector<128x384xbf16>, vector<2x384xf32> -> vector<2x384xf32>
    %18 = vector.extract_strided_slice %3 {offsets = [0, 0], sizes = [2, 128], strides = [1, 1]} : vector<2x384xf32> to vector<2x128xf32>
    %19 = vector.extract_strided_slice %17 {offsets = [0, 0], sizes = [2, 128], strides = [1, 1]} : vector<2x384xf32> to vector<2x128xf32>
    %20 = arith.addf %18, %19 : vector<2x128xf32>
    %21 = arith.negf %20 : vector<2x128xf32>
    %22 = math.exp %21 : vector<2x128xf32>
    %cst_9 = arith.constant 1.000000e+00 : f32
    %23 = vector.broadcast %cst_9 : f32 to vector<2x128xf32>
    %24 = arith.addf %23, %22 : vector<2x128xf32>
    %25 = arith.divf %23, %24 : vector<2x128xf32>
    %26 = vector.extract_strided_slice %3 {offsets = [0, 128], sizes = [2, 128], strides = [1, 1]} : vector<2x384xf32> to vector<2x128xf32>
    %27 = vector.extract_strided_slice %17 {offsets = [0, 128], sizes = [2, 128], strides = [1, 1]} : vector<2x384xf32> to vector<2x128xf32>
    %28 = arith.addf %26, %27 : vector<2x128xf32>
    %29 = arith.negf %28 : vector<2x128xf32>
    %30 = math.exp %29 : vector<2x128xf32>
    %cst_10 = arith.constant 1.000000e+00 : f32
    %31 = vector.broadcast %cst_10 : f32 to vector<2x128xf32>
    %32 = arith.addf %31, %30 : vector<2x128xf32>
    %33 = arith.divf %31, %32 : vector<2x128xf32>
    %34 = vector.extract_strided_slice %3 {offsets = [0, 256], sizes = [2, 128], strides = [1, 1]} : vector<2x384xf32> to vector<2x128xf32>
    %35 = vector.extract_strided_slice %17 {offsets = [0, 256], sizes = [2, 128], strides = [1, 1]} : vector<2x384xf32> to vector<2x128xf32>
    %36 = arith.addf %35, %14 : vector<2x128xf32>
    %37 = arith.mulf %25, %36 : vector<2x128xf32>
    %38 = arith.addf %34, %37 : vector<2x128xf32>
    %39 = math.tanh %38 : vector<2x128xf32>
    %40 = arith.subf %15, %39 : vector<2x128xf32>
    %41 = arith.mulf %33, %40 : vector<2x128xf32>
    %42 = arith.addf %39, %41 : vector<2x128xf32>
    %43 = arith.truncf %42 : vector<2x128xf32> to vector<2x128xbf16>
    %cst_11 = arith.constant dense<0.000000e+00> : vector<2x384xf32>
    %44 = tpu.matmul %43, %11, %cst_11 {dimension_numbers = #tpu.dot_dimension_numbers<[1], [0], [0], [1], [0, 0, 1, 1], [], []>} : vector<2x128xbf16>, vector<128x384xbf16>, vector<2x384xf32> -> vector<2x384xf32>
    %45 = vector.extract_strided_slice %4 {offsets = [0, 0], sizes = [2, 128], strides = [1, 1]} : vector<2x384xf32> to vector<2x128xf32>
    %46 = vector.extract_strided_slice %44 {offsets = [0, 0], sizes = [2, 128], strides = [1, 1]} : vector<2x384xf32> to vector<2x128xf32>
    %47 = arith.addf %45, %46 : vector<2x128xf32>
    %48 = arith.negf %47 : vector<2x128xf32>
    %49 = math.exp %48 : vector<2x128xf32>
    %cst_12 = arith.constant 1.000000e+00 : f32
    %50 = vector.broadcast %cst_12 : f32 to vector<2x128xf32>
    %51 = arith.addf %50, %49 : vector<2x128xf32>
    %52 = arith.divf %50, %51 : vector<2x128xf32>
    %53 = vector.extract_strided_slice %4 {offsets = [0, 128], sizes = [2, 128], strides = [1, 1]} : vector<2x384xf32> to vector<2x128xf32>
    %54 = vector.extract_strided_slice %44 {offsets = [0, 128], sizes = [2, 128], strides = [1, 1]} : vector<2x384xf32> to vector<2x128xf32>
    %55 = arith.addf %53, %54 : vector<2x128xf32>
    %56 = arith.negf %55 : vector<2x128xf32>
    %57 = math.exp %56 : vector<2x128xf32>
    %cst_13 = arith.constant 1.000000e+00 : f32
    %58 = vector.broadcast %cst_13 : f32 to vector<2x128xf32>
    %59 = arith.addf %58, %57 : vector<2x128xf32>
    %60 = arith.divf %58, %59 : vector<2x128xf32>
    %61 = vector.extract_strided_slice %4 {offsets = [0, 256], sizes = [2, 128], strides = [1, 1]} : vector<2x384xf32> to vector<2x128xf32>
    %62 = vector.extract_strided_slice %44 {offsets = [0, 256], sizes = [2, 128], strides = [1, 1]} : vector<2x384xf32> to vector<2x128xf32>
    %63 = arith.addf %62, %14 : vector<2x128xf32>
    %64 = arith.mulf %52, %63 : vector<2x128xf32>
    %65 = arith.addf %61, %64 : vector<2x128xf32>
    %66 = math.tanh %65 : vector<2x128xf32>
    %67 = arith.subf %42, %66 : vector<2x128xf32>
    %68 = arith.mulf %60, %67 : vector<2x128xf32>
    %69 = arith.addf %66, %68 : vector<2x128xf32>
    %70 = arith.truncf %69 : vector<2x128xf32> to vector<2x128xbf16>
    %cst_14 = arith.constant dense<0.000000e+00> : vector<2x384xf32>
    %71 = tpu.matmul %70, %11, %cst_14 {dimension_numbers = #tpu.dot_dimension_numbers<[1], [0], [0], [1], [0, 0, 1, 1], [], []>} : vector<2x128xbf16>, vector<128x384xbf16>, vector<2x384xf32> -> vector<2x384xf32>
    %72 = vector.extract_strided_slice %5 {offsets = [0, 0], sizes = [2, 128], strides = [1, 1]} : vector<2x384xf32> to vector<2x128xf32>
    %73 = vector.extract_strided_slice %71 {offsets = [0, 0], sizes = [2, 128], strides = [1, 1]} : vector<2x384xf32> to vector<2x128xf32>
    %74 = arith.addf %72, %73 : vector<2x128xf32>
    %75 = arith.negf %74 : vector<2x128xf32>
    %76 = math.exp %75 : vector<2x128xf32>
    %cst_15 = arith.constant 1.000000e+00 : f32
    %77 = vector.broadcast %cst_15 : f32 to vector<2x128xf32>
    %78 = arith.addf %77, %76 : vector<2x128xf32>
    %79 = arith.divf %77, %78 : vector<2x128xf32>
    %80 = vector.extract_strided_slice %5 {offsets = [0, 128], sizes = [2, 128], strides = [1, 1]} : vector<2x384xf32> to vector<2x128xf32>
    %81 = vector.extract_strided_slice %71 {offsets = [0, 128], sizes = [2, 128], strides = [1, 1]} : vector<2x384xf32> to vector<2x128xf32>
    %82 = arith.addf %80, %81 : vector<2x128xf32>
    %83 = arith.negf %82 : vector<2x128xf32>
    %84 = math.exp %83 : vector<2x128xf32>
    %cst_16 = arith.constant 1.000000e+00 : f32
    %85 = vector.broadcast %cst_16 : f32 to vector<2x128xf32>
    %86 = arith.addf %85, %84 : vector<2x128xf32>
    %87 = arith.divf %85, %86 : vector<2x128xf32>
    %88 = vector.extract_strided_slice %5 {offsets = [0, 256], sizes = [2, 128], strides = [1, 1]} : vector<2x384xf32> to vector<2x128xf32>
    %89 = vector.extract_strided_slice %71 {offsets = [0, 256], sizes = [2, 128], strides = [1, 1]} : vector<2x384xf32> to vector<2x128xf32>
    %90 = arith.addf %89, %14 : vector<2x128xf32>
    %91 = arith.mulf %79, %90 : vector<2x128xf32>
    %92 = arith.addf %88, %91 : vector<2x128xf32>
    %93 = math.tanh %92 : vector<2x128xf32>
    %94 = arith.subf %69, %93 : vector<2x128xf32>
    %95 = arith.mulf %87, %94 : vector<2x128xf32>
    %96 = arith.addf %93, %95 : vector<2x128xf32>
    %97 = arith.truncf %96 : vector<2x128xf32> to vector<2x128xbf16>
    %cst_17 = arith.constant dense<0.000000e+00> : vector<2x384xf32>
    %98 = tpu.matmul %97, %11, %cst_17 {dimension_numbers = #tpu.dot_dimension_numbers<[1], [0], [0], [1], [0, 0, 1, 1], [], []>} : vector<2x128xbf16>, vector<128x384xbf16>, vector<2x384xf32> -> vector<2x384xf32>
    %99 = vector.extract_strided_slice %6 {offsets = [0, 0], sizes = [2, 128], strides = [1, 1]} : vector<2x384xf32> to vector<2x128xf32>
    %100 = vector.extract_strided_slice %98 {offsets = [0, 0], sizes = [2, 128], strides = [1, 1]} : vector<2x384xf32> to vector<2x128xf32>
    %101 = arith.addf %99, %100 : vector<2x128xf32>
    %102 = arith.negf %101 : vector<2x128xf32>
    %103 = math.exp %102 : vector<2x128xf32>
    %cst_18 = arith.constant 1.000000e+00 : f32
    %104 = vector.broadcast %cst_18 : f32 to vector<2x128xf32>
    %105 = arith.addf %104, %103 : vector<2x128xf32>
    %106 = arith.divf %104, %105 : vector<2x128xf32>
    %107 = vector.extract_strided_slice %6 {offsets = [0, 128], sizes = [2, 128], strides = [1, 1]} : vector<2x384xf32> to vector<2x128xf32>
    %108 = vector.extract_strided_slice %98 {offsets = [0, 128], sizes = [2, 128], strides = [1, 1]} : vector<2x384xf32> to vector<2x128xf32>
    %109 = arith.addf %107, %108 : vector<2x128xf32>
    %110 = arith.negf %109 : vector<2x128xf32>
    %111 = math.exp %110 : vector<2x128xf32>
    %cst_19 = arith.constant 1.000000e+00 : f32
    %112 = vector.broadcast %cst_19 : f32 to vector<2x128xf32>
    %113 = arith.addf %112, %111 : vector<2x128xf32>
    %114 = arith.divf %112, %113 : vector<2x128xf32>
    %115 = vector.extract_strided_slice %6 {offsets = [0, 256], sizes = [2, 128], strides = [1, 1]} : vector<2x384xf32> to vector<2x128xf32>
    %116 = vector.extract_strided_slice %98 {offsets = [0, 256], sizes = [2, 128], strides = [1, 1]} : vector<2x384xf32> to vector<2x128xf32>
    %117 = arith.addf %116, %14 : vector<2x128xf32>
    %118 = arith.mulf %106, %117 : vector<2x128xf32>
    %119 = arith.addf %115, %118 : vector<2x128xf32>
    %120 = math.tanh %119 : vector<2x128xf32>
    %121 = arith.subf %96, %120 : vector<2x128xf32>
    %122 = arith.mulf %114, %121 : vector<2x128xf32>
    %123 = arith.addf %120, %122 : vector<2x128xf32>
    %124 = arith.truncf %123 : vector<2x128xf32> to vector<2x128xbf16>
    %cst_20 = arith.constant dense<0.000000e+00> : vector<2x384xf32>
    %125 = tpu.matmul %124, %11, %cst_20 {dimension_numbers = #tpu.dot_dimension_numbers<[1], [0], [0], [1], [0, 0, 1, 1], [], []>} : vector<2x128xbf16>, vector<128x384xbf16>, vector<2x384xf32> -> vector<2x384xf32>
    %126 = vector.extract_strided_slice %7 {offsets = [0, 0], sizes = [2, 128], strides = [1, 1]} : vector<2x384xf32> to vector<2x128xf32>
    %127 = vector.extract_strided_slice %125 {offsets = [0, 0], sizes = [2, 128], strides = [1, 1]} : vector<2x384xf32> to vector<2x128xf32>
    %128 = arith.addf %126, %127 : vector<2x128xf32>
    %129 = arith.negf %128 : vector<2x128xf32>
    %130 = math.exp %129 : vector<2x128xf32>
    %cst_21 = arith.constant 1.000000e+00 : f32
    %131 = vector.broadcast %cst_21 : f32 to vector<2x128xf32>
    %132 = arith.addf %131, %130 : vector<2x128xf32>
    %133 = arith.divf %131, %132 : vector<2x128xf32>
    %134 = vector.extract_strided_slice %7 {offsets = [0, 128], sizes = [2, 128], strides = [1, 1]} : vector<2x384xf32> to vector<2x128xf32>
    %135 = vector.extract_strided_slice %125 {offsets = [0, 128], sizes = [2, 128], strides = [1, 1]} : vector<2x384xf32> to vector<2x128xf32>
    %136 = arith.addf %134, %135 : vector<2x128xf32>
    %137 = arith.negf %136 : vector<2x128xf32>
    %138 = math.exp %137 : vector<2x128xf32>
    %cst_22 = arith.constant 1.000000e+00 : f32
    %139 = vector.broadcast %cst_22 : f32 to vector<2x128xf32>
    %140 = arith.addf %139, %138 : vector<2x128xf32>
    %141 = arith.divf %139, %140 : vector<2x128xf32>
    %142 = vector.extract_strided_slice %7 {offsets = [0, 256], sizes = [2, 128], strides = [1, 1]} : vector<2x384xf32> to vector<2x128xf32>
    %143 = vector.extract_strided_slice %125 {offsets = [0, 256], sizes = [2, 128], strides = [1, 1]} : vector<2x384xf32> to vector<2x128xf32>
    %144 = arith.addf %143, %14 : vector<2x128xf32>
    %145 = arith.mulf %133, %144 : vector<2x128xf32>
    %146 = arith.addf %142, %145 : vector<2x128xf32>
    %147 = math.tanh %146 : vector<2x128xf32>
    %148 = arith.subf %123, %147 : vector<2x128xf32>
    %149 = arith.mulf %141, %148 : vector<2x128xf32>
    %150 = arith.addf %147, %149 : vector<2x128xf32>
    %151 = arith.truncf %150 : vector<2x128xf32> to vector<2x128xbf16>
    %cst_23 = arith.constant dense<0.000000e+00> : vector<2x384xf32>
    %152 = tpu.matmul %151, %11, %cst_23 {dimension_numbers = #tpu.dot_dimension_numbers<[1], [0], [0], [1], [0, 0, 1, 1], [], []>} : vector<2x128xbf16>, vector<128x384xbf16>, vector<2x384xf32> -> vector<2x384xf32>
    %153 = vector.extract_strided_slice %8 {offsets = [0, 0], sizes = [2, 128], strides = [1, 1]} : vector<2x384xf32> to vector<2x128xf32>
    %154 = vector.extract_strided_slice %152 {offsets = [0, 0], sizes = [2, 128], strides = [1, 1]} : vector<2x384xf32> to vector<2x128xf32>
    %155 = arith.addf %153, %154 : vector<2x128xf32>
    %156 = arith.negf %155 : vector<2x128xf32>
    %157 = math.exp %156 : vector<2x128xf32>
    %cst_24 = arith.constant 1.000000e+00 : f32
    %158 = vector.broadcast %cst_24 : f32 to vector<2x128xf32>
    %159 = arith.addf %158, %157 : vector<2x128xf32>
    %160 = arith.divf %158, %159 : vector<2x128xf32>
    %161 = vector.extract_strided_slice %8 {offsets = [0, 128], sizes = [2, 128], strides = [1, 1]} : vector<2x384xf32> to vector<2x128xf32>
    %162 = vector.extract_strided_slice %152 {offsets = [0, 128], sizes = [2, 128], strides = [1, 1]} : vector<2x384xf32> to vector<2x128xf32>
    %163 = arith.addf %161, %162 : vector<2x128xf32>
    %164 = arith.negf %163 : vector<2x128xf32>
    %165 = math.exp %164 : vector<2x128xf32>
    %cst_25 = arith.constant 1.000000e+00 : f32
    %166 = vector.broadcast %cst_25 : f32 to vector<2x128xf32>
    %167 = arith.addf %166, %165 : vector<2x128xf32>
    %168 = arith.divf %166, %167 : vector<2x128xf32>
    %169 = vector.extract_strided_slice %8 {offsets = [0, 256], sizes = [2, 128], strides = [1, 1]} : vector<2x384xf32> to vector<2x128xf32>
    %170 = vector.extract_strided_slice %152 {offsets = [0, 256], sizes = [2, 128], strides = [1, 1]} : vector<2x384xf32> to vector<2x128xf32>
    %171 = arith.addf %170, %14 : vector<2x128xf32>
    %172 = arith.mulf %160, %171 : vector<2x128xf32>
    %173 = arith.addf %169, %172 : vector<2x128xf32>
    %174 = math.tanh %173 : vector<2x128xf32>
    %175 = arith.subf %150, %174 : vector<2x128xf32>
    %176 = arith.mulf %168, %175 : vector<2x128xf32>
    %177 = arith.addf %174, %176 : vector<2x128xf32>
    %178 = arith.truncf %177 : vector<2x128xf32> to vector<2x128xbf16>
    %cst_26 = arith.constant dense<0.000000e+00> : vector<2x384xf32>
    %179 = tpu.matmul %178, %11, %cst_26 {dimension_numbers = #tpu.dot_dimension_numbers<[1], [0], [0], [1], [0, 0, 1, 1], [], []>} : vector<2x128xbf16>, vector<128x384xbf16>, vector<2x384xf32> -> vector<2x384xf32>
    %180 = vector.extract_strided_slice %9 {offsets = [0, 0], sizes = [2, 128], strides = [1, 1]} : vector<2x384xf32> to vector<2x128xf32>
    %181 = vector.extract_strided_slice %179 {offsets = [0, 0], sizes = [2, 128], strides = [1, 1]} : vector<2x384xf32> to vector<2x128xf32>
    %182 = arith.addf %180, %181 : vector<2x128xf32>
    %183 = arith.negf %182 : vector<2x128xf32>
    %184 = math.exp %183 : vector<2x128xf32>
    %cst_27 = arith.constant 1.000000e+00 : f32
    %185 = vector.broadcast %cst_27 : f32 to vector<2x128xf32>
    %186 = arith.addf %185, %184 : vector<2x128xf32>
    %187 = arith.divf %185, %186 : vector<2x128xf32>
    %188 = vector.extract_strided_slice %9 {offsets = [0, 128], sizes = [2, 128], strides = [1, 1]} : vector<2x384xf32> to vector<2x128xf32>
    %189 = vector.extract_strided_slice %179 {offsets = [0, 128], sizes = [2, 128], strides = [1, 1]} : vector<2x384xf32> to vector<2x128xf32>
    %190 = arith.addf %188, %189 : vector<2x128xf32>
    %191 = arith.negf %190 : vector<2x128xf32>
    %192 = math.exp %191 : vector<2x128xf32>
    %cst_28 = arith.constant 1.000000e+00 : f32
    %193 = vector.broadcast %cst_28 : f32 to vector<2x128xf32>
    %194 = arith.addf %193, %192 : vector<2x128xf32>
    %195 = arith.divf %193, %194 : vector<2x128xf32>
    %196 = vector.extract_strided_slice %9 {offsets = [0, 256], sizes = [2, 128], strides = [1, 1]} : vector<2x384xf32> to vector<2x128xf32>
    %197 = vector.extract_strided_slice %179 {offsets = [0, 256], sizes = [2, 128], strides = [1, 1]} : vector<2x384xf32> to vector<2x128xf32>
    %198 = arith.addf %197, %14 : vector<2x128xf32>
    %199 = arith.mulf %187, %198 : vector<2x128xf32>
    %200 = arith.addf %196, %199 : vector<2x128xf32>
    %201 = math.tanh %200 : vector<2x128xf32>
    %202 = arith.subf %177, %201 : vector<2x128xf32>
    %203 = arith.mulf %195, %202 : vector<2x128xf32>
    %204 = arith.addf %201, %203 : vector<2x128xf32>
    %205 = arith.truncf %204 : vector<2x128xf32> to vector<2x128xbf16>
    %cst_29 = arith.constant dense<0.000000e+00> : vector<2x384xf32>
    %206 = tpu.matmul %205, %11, %cst_29 {dimension_numbers = #tpu.dot_dimension_numbers<[1], [0], [0], [1], [0, 0, 1, 1], [], []>} : vector<2x128xbf16>, vector<128x384xbf16>, vector<2x384xf32> -> vector<2x384xf32>
    %207 = vector.extract_strided_slice %10 {offsets = [0, 0], sizes = [2, 128], strides = [1, 1]} : vector<2x384xf32> to vector<2x128xf32>
    %208 = vector.extract_strided_slice %206 {offsets = [0, 0], sizes = [2, 128], strides = [1, 1]} : vector<2x384xf32> to vector<2x128xf32>
    %209 = arith.addf %207, %208 : vector<2x128xf32>
    %210 = arith.negf %209 : vector<2x128xf32>
    %211 = math.exp %210 : vector<2x128xf32>
    %cst_30 = arith.constant 1.000000e+00 : f32
    %212 = vector.broadcast %cst_30 : f32 to vector<2x128xf32>
    %213 = arith.addf %212, %211 : vector<2x128xf32>
    %214 = arith.divf %212, %213 : vector<2x128xf32>
    %215 = vector.extract_strided_slice %10 {offsets = [0, 128], sizes = [2, 128], strides = [1, 1]} : vector<2x384xf32> to vector<2x128xf32>
    %216 = vector.extract_strided_slice %206 {offsets = [0, 128], sizes = [2, 128], strides = [1, 1]} : vector<2x384xf32> to vector<2x128xf32>
    %217 = arith.addf %215, %216 : vector<2x128xf32>
    %218 = arith.negf %217 : vector<2x128xf32>
    %219 = math.exp %218 : vector<2x128xf32>
    %cst_31 = arith.constant 1.000000e+00 : f32
    %220 = vector.broadcast %cst_31 : f32 to vector<2x128xf32>
    %221 = arith.addf %220, %219 : vector<2x128xf32>
    %222 = arith.divf %220, %221 : vector<2x128xf32>
    %223 = vector.extract_strided_slice %10 {offsets = [0, 256], sizes = [2, 128], strides = [1, 1]} : vector<2x384xf32> to vector<2x128xf32>
    %224 = vector.extract_strided_slice %206 {offsets = [0, 256], sizes = [2, 128], strides = [1, 1]} : vector<2x384xf32> to vector<2x128xf32>
    %225 = arith.addf %224, %14 : vector<2x128xf32>
    %226 = arith.mulf %214, %225 : vector<2x128xf32>
    %227 = arith.addf %223, %226 : vector<2x128xf32>
    %228 = math.tanh %227 : vector<2x128xf32>
    %229 = arith.subf %204, %228 : vector<2x128xf32>
    %230 = arith.mulf %222, %229 : vector<2x128xf32>
    %231 = arith.addf %228, %230 : vector<2x128xf32>
    %232 = arith.truncf %231 : vector<2x128xf32> to vector<2x128xbf16>
    %c0_32 = arith.constant 0 : index
    %c0_33 = arith.constant 0 : index
    %233 = vector.load %arg4[%c0_32, %c0_33] : memref<128x128xbf16, #tpu.memory_space<vmem>>, vector<128x128xbf16>
    %cst_34 = arith.constant dense<0.000000e+00> : vector<2x128xf32>
    %234 = tpu.matmul %232, %233, %cst_34 {dimension_numbers = #tpu.dot_dimension_numbers<[1], [0], [0], [1], [0, 0, 1, 1], [], []>} : vector<2x128xbf16>, vector<128x128xbf16>, vector<2x128xf32> -> vector<2x128xf32>
    %c0_35 = arith.constant 0 : index
    %c0_36 = arith.constant 0 : index
    %235 = vector.load %arg5[%c0_35, %c0_36] : memref<1x128xf32, #tpu.memory_space<vmem>>, vector<1x128xf32>
    %236 = vector.broadcast %235 : vector<1x128xf32> to vector<2x128xf32>
    %237 = arith.addf %234, %236 : vector<2x128xf32>
    %cst_37 = arith.constant 0.000000e+00 : f32
    %238 = vector.broadcast %cst_37 : f32 to vector<2x128xf32>
    %239 = arith.maximumf %237, %238 : vector<2x128xf32>
    %240 = arith.truncf %239 : vector<2x128xf32> to vector<2x128xbf16>
    %c0_38 = arith.constant 0 : index
    %c0_39 = arith.constant 0 : index
    %241 = vector.load %arg6[%c0_38, %c0_39] : memref<128x128xbf16, #tpu.memory_space<vmem>>, vector<128x128xbf16>
    %cst_40 = arith.constant dense<0.000000e+00> : vector<2x128xf32>
    %242 = tpu.matmul %240, %241, %cst_40 {dimension_numbers = #tpu.dot_dimension_numbers<[1], [0], [0], [1], [0, 0, 1, 1], [], []>} : vector<2x128xbf16>, vector<128x128xbf16>, vector<2x128xf32> -> vector<2x128xf32>
    %c0_41 = arith.constant 0 : index
    %c0_42 = arith.constant 0 : index
    %243 = vector.load %arg7[%c0_41, %c0_42] : memref<1x128xf32, #tpu.memory_space<vmem>>, vector<1x128xf32>
    %244 = vector.broadcast %243 : vector<1x128xf32> to vector<2x128xf32>
    %245 = arith.addf %242, %244 : vector<2x128xf32>
    %c0_43 = arith.constant 0 : index
    %c0_44 = arith.constant 0 : index
    %246 = vector.load %arg8[%c0_43, %c0_44] : memref<2x128xf32, #tpu.memory_space<vmem>>, vector<2x128xf32>
    tpu.vector_store %arg8[%c0_43, %c0_44], %245 {strides = array<i32>} : memref<2x128xf32, #tpu.memory_space<vmem>>, vector<2x128xf32>,
    return
  }
}

</mosaic_0001>

<bundles_post_ra>
// kernel: forward.1
= control target key start
LH: loop header
LB: loop body
LE: loop exit
PB: predicated region body
PF: predicated region fallthrough
CT: control target
= control target key end

     0   :  { %vm72_vm0 = vcmask 1040384   ;;  %v2062_v3 = vmov 0   ;;  %v2063_v10 = vmov 0.0   ;;  %vm2064_vm1 = vmmov 0   ;;  %s2743_s0 = inlined_call_operand.vmem [shape: bf16[16,17], index: 0, kind: input, shape index: {}]   ;;  %s2744_s1 = inlined_call_operand.vmem [shape: bf16[17,384], index: 1, kind: input, shape index: {}]   ;;  %s2745_s2 = inlined_call_operand.vmem [shape: bf16[128,384], index: 2, kind: input, shape index: {}]   ;;  %s2746_s3 = inlined_call_operand.vmem [shape: f32[1,128], index: 3, kind: input, shape index: {}]   ;;  %s2747_s4 = inlined_call_operand.vmem [shape: bf16[128,128], index: 4, kind: input, shape index: {}]   ;;  %s2748_s5 = inlined_call_operand.vmem [shape: f32[1,128], index: 5, kind: input, shape index: {}]   ;;  %s2749_s6 = inlined_call_operand.vmem [shape: bf16[128,128], index: 6, kind: input, shape index: {}]   ;;  %s2750_s7 = inlined_call_operand.vmem [shape: f32[1,128], index: 7, kind: input, shape index: {}]   ;;  %s2751_s8 = inlined_call_operand.hbm [shape: f32[2,128], index: 8, kind: output, shape index: {}]  }
   0x1   :  { %v1885_v0 = vld [vmem:[%s2744_s1 + $0x4] ss:$12 sps:$4 sm:$0xff]   ;;  %v1887_v1 = vld [vmem:[%s2744_s1] ss:$12 sps:$4 sm:$0xff]   ;;  %v37_v2 = vld [vmem:[%s2744_s1 + $0x18] sm:$0x11]  ;;  %116 = vmatprep.mubr.bf16.mxu0 %v2062_v3  ;;  %1673 = vmatprep.subr.bf16.mxu1 %v2063_v10 }
   0x2   :  { %v74_v4 = vsel %vm72_vm0, 65535, %v2062_v3  ;;  %84 = vmatprep.subr.bf16.mxu0 %v1885_v0  ;;  %v1517_v5 = vcombine.high %v37_v2, %v37_v2  ;;  %v1516_v6 = vcombine.low %v37_v2, %v37_v2  ;;  %v2125_v9 = vld [vmem:[%s2745_s2 + $0x4] ss:$12 sps:$4 sm:$0xff]   ;;  %1677 = vmatprep.mubr.msk.bf16.mxu1 %vm2064_vm1, %v2063_v10  ;;  %vm68_vm2 = vcmask 138240   ;;  %v2136_v12 = vld [vmem:[%s2745_s2] ss:$12 sps:$4 sm:$0xff]  }
   0x3   :  { %85 = vmatpush1.bf16.msra.mxu0 %v1887_v1  ;;  %v1890_v11 = vld [vmem:[%s2743_s0] sm:$0xff]   ;;  %v2141_v13 = vld [vmem:[%s2745_s2 + $0x1c] ss:$12 sps:$4 sm:$0xff]   ;;  %v2180_v21 = vld [vmem:[%s2745_s2 + $0x4c] ss:$12 sps:$4 sm:$0xff]  }
   0x4   :  { %v79_v7 = vand.u32 %v1517_v5, %v74_v4  ;;  %v76_v8 = vand.u32 %v1516_v6, %v74_v4  ;;  %v1903_v14 = vld [vmem:[%s2744_s1 + $0x8] ss:$12 sps:$4 sm:$0xff]   ;;  %v2152_v15 = vld [vmem:[%s2745_s2 + $0x18] ss:$12 sps:$4 sm:$0xff]   ;;  %v2168_v19 = vld [vmem:[%s2745_s2 + $0x30] ss:$12 sps:$4 sm:$0xff]  }
   0x5   :  { %1674 = vmatpush3.bf16.msra.mxu1 %v1903_v14  ;;  %v1907_v16 = vld [vmem:[%s2744_s1 + $0x20] ss:$0 sps:$4 sm:$0x11]   ;;  %v2174_v20 = vld [vmem:[%s2745_s2 + $0x8] ss:$12 sps:$4 sm:$0xff]  }
   0x6   :  { %86 = vmatprep.subr.bf16.mxu0 %v79_v7  ;;  %1675 = vmatprep.subr.bf16.mxu1 %v2063_v10  ;;  %v2162_v17 = vld [vmem:[%s2745_s2 + $0x34] ss:$12 sps:$4 sm:$0xff]   ;;  %v82_v18 = vand.u32 %v1907_v16, %v74_v4  ;;  %v2200_v24 = vld [vmem:[%s2745_s2 + $0x64] ss:$12 sps:$4 sm:$0xff]   ;;  %v2213_v26 = vld [vmem:[%s2745_s2 + $0x7c] ss:$12 sps:$4 sm:$0xff]  }
   0x7   :  { %87 = vmatpush1.bf16.msra.mxu0 %v76_v8  ;;  %v2186_v22 = vld [vmem:[%s2745_s2 + $0x48] ss:$12 sps:$4 sm:$0xff]   ;;  %v2194_v23 = vld [vmem:[%s2745_s2 + $0x20] ss:$12 sps:$4 sm:$0xff]   ;;  %v2218_v27 = vld [vmem:[%s2745_s2 + $0x38] ss:$12 sps:$4 sm:$0xff]  }
   0x8   :  { %335 = vmatprep.subr.bf16.mxu0 %v2125_v9  ;;  %v2206_v25 = vld [vmem:[%s2745_s2 + $0x60] ss:$12 sps:$4 sm:$0xff]   ;;  %v2227_v28 = vld [vmem:[%s2745_s2 + $0x78] ss:$12 sps:$4 sm:$0xff]   ;;  %v2232_v29 = vld [vmem:[%s2745_s2 + $0x50] ss:$12 sps:$4 sm:$0xff]  }
   0x9   :  { %1676 = vmatpush3.bf16.msra.mxu1 %v82_v18  ;;  %v2237_v30 = vld [vmem:[%s2745_s2 + $0x94] ss:$12 sps:$4 sm:$0xff]   ;;  %v2246_v31 = vld [vmem:[%s2745_s2 + $0x90] ss:$12 sps:$4 sm:$0xff]   ;;  %v2256_v33 = vld [vmem:[%s2745_s2 + $0xac] ss:$12 sps:$4 sm:$0xff]  }
   0xa   :  { %1519 = vmatmul.mubr.msk.bf16.vlgmr.msra.gmra.mrb[0].mxu0 %vm68_vm2, %v1890_v11  ;;  %1681 = vmatprep.subr.bf16.mxu1 %v2063_v10  ;;  %v2251_v32 = vld [vmem:[%s2745_s2 + $0x68] ss:$12 sps:$4 sm:$0xff]  }
   0xb   :  { %336 = vmatpush1.bf16.msra.mxu0 %v2136_v12  ;;  %367 = vmatprep.mubr.bf16.mxu0 %v2062_v3 }
   0xc   :  { %337 = vmatprep.subr.bf16.mxu0 %v2141_v13  ;;  %1678 = vmatmul.mubr.msk.bf16.vlgmr.msra.gmra.mrb[0].mxu1 %vm68_vm2, %v1890_v11 }
   0xd   :  { %1682 = vmatpush3.bf16.msra.mxu1 %v2174_v20  ;;  %1697 = vmatprep.mubr.msk.bf16.mxu1 %vm2064_vm1, %v2063_v10 }
   0xe   :  { %1683 = vmatprep.subr.bf16.mxu1 %v2063_v10 }
   0xf   :  { %338 = vmatpush1.bf16.msra.mxu0 %v2152_v15 }
  0x10   :  { %339 = vmatprep.subr.bf16.mxu0 %v2162_v17 }
  0x11   :  { %1684 = vmatpush3.bf16.msra.mxu1 %v2194_v23 }
  0x12   :  { %1685 = vmatprep.subr.bf16.mxu1 %v2063_v10 }
  0x13   :  { %340 = vmatpush1.bf16.msra.mxu0 %v2168_v19 }
  0x14   :  { %341 = vmatprep.subr.bf16.mxu0 %v2180_v21 }
  0x15   :  { %1686 = vmatpush3.bf16.msra.mxu1 %v2218_v27 }
  0x16   :  { %1687 = vmatprep.subr.bf16.mxu1 %v2063_v10 }
  0x17   :  { %342 = vmatpush1.bf16.msra.mxu0 %v2186_v22 }
  0x18   :  { %343 = vmatprep.subr.bf16.mxu0 %v2200_v24 }
  0x19   :  { %1688 = vmatpush3.bf16.msra.mxu1 %v2232_v29 }
  0x1a   :  { %1689 = vmatprep.subr.bf16.mxu1 %v2063_v10 }
  0x1b   :  { %344 = vmatpush1.bf16.msra.mxu0 %v2206_v25 }
  0x1c   :  { %345 = vmatprep.subr.bf16.mxu0 %v2213_v26 }
  0x1f   :  { %346 = vmatpush1.bf16.msra.mxu0 %v2227_v28 }
  0x20   :  { %347 = vmatprep.subr.bf16.mxu0 %v2237_v30 }
  0x21   :  { %13 = vsyncpa [#allocation3], 0  ;;  %v2266_v34 = vld [vmem:[%s2745_s2 + $0xa8] ss:$12 sps:$4 sm:$0xff]   ;;  %1690 = vmatpush3.bf16.msra.mxu1 %v2251_v32  ;;  %v2272_v35 = vld [vmem:[%s2745_s2 + $0x80] ss:$12 sps:$4 sm:$0xff]  }
  0x22   :  { %1691 = vmatprep.subr.bf16.mxu1 %v2063_v10  ;;  %v2281_v36 = vld [vmem:[%s2745_s2 + $0x98] ss:$12 sps:$4 sm:$0xff]   ;;  %v2290_v37 = vld [vmem:[%s2745_s2 + $0xb0] ss:$12 sps:$4 sm:$0xff]   ;;  %v2348_v60 = vld [vmem:[%s2746_s3] ss:$0 sm:$0xff] }
  0x23   :  { %348 = vmatpush1.bf16.msra.mxu0 %v2246_v31  ;;  %s2065_s13 = smov [#allocation2]  }
  0x24   :  { %349 = vmatprep.subr.bf16.mxu0 %v2256_v33  ;;  %s1504_s14 = sshll.u32 %s2065_s13, 4  ;;  %s1505_s14 = int_to_ptr.vmem [resolvable:$true] %s1504_s14 }
  0x25   :  { %1692 = vmatpush3.bf16.msra.mxu1 %v2272_v35  ;;  %p2043_p1 = scmp.lt.s32.totalorder %s1505_s14, %s1505_s14 }
  0x26   :  { %1693 = vmatprep.subr.bf16.mxu1 %v2063_v10 }
  0x27   :  { %350 = vmatpush1.bf16.msra.mxu0 %v2266_v34 }
  0x28   :  { %438 = vmatprep.subr.bf16.mxu0 %v2125_v9 }
  0x29   :  { %1694 = vmatpush3.bf16.msra.mxu1 %v2281_v36 }
  0x2a   :  { %368 = vmatmul.mubr.bf16.vlgmr.msra.gmra.mrb[4].mxu0 %v2062_v3  ;;  %1695 = vmatprep.subr.bf16.mxu1 %v2063_v10 }
  0x2b   :  { %439 = vmatpush1.bf16.msra.mxu0 %v2136_v12  ;;  %470 = vmatprep.mubr.bf16.mxu0 %v2062_v3 }
  0x2c   :  { %440 = vmatprep.subr.bf16.mxu0 %v2141_v13 }
  0x2d   :  { %1696 = vmatpush3.bf16.msra.mxu1 %v2290_v37 }
  0x2e   :  { %1701 = vmatprep.subr.bf16.mxu1 %v2063_v10 }
  0x2f   :  { %441 = vmatpush1.bf16.msra.mxu0 %v2152_v15 }
  0x30   :  { %442 = vmatprep.subr.bf16.mxu0 %v2162_v17  ;;  %1698 = vmatmul.mubr.bf16.vlgmr.msra.gmra.mrb[4].mxu1 %v2062_v3 }
  0x31   :  { %1702 = vmatpush3.bf16.msra.mxu1 %v2174_v20  ;;  %1717 = vmatprep.mubr.msk.bf16.mxu1 %vm2064_vm1, %v2063_v10 }
  0x32   :  { %1703 = vmatprep.subr.bf16.mxu1 %v2063_v10 }
  0x33   :  { %443 = vmatpush1.bf16.msra.mxu0 %v2168_v19 }
  0x34   :  { %444 = vmatprep.subr.bf16.mxu0 %v2180_v21 }
  0x35   :  { %1704 = vmatpush3.bf16.msra.mxu1 %v2194_v23 }
  0x36   :  { %1705 = vmatprep.subr.bf16.mxu1 %v2063_v10 }
  0x37   :  { %445 = vmatpush1.bf16.msra.mxu0 %v2186_v22 }
  0x38   :  { %446 = vmatprep.subr.bf16.mxu0 %v2200_v24 }
  0x39   :  { %1706 = vmatpush3.bf16.msra.mxu1 %v2218_v27 }
  0x3a   :  { %1707 = vmatprep.subr.bf16.mxu1 %v2063_v10 }
  0x3b   :  { %447 = vmatpush1.bf16.msra.mxu0 %v2206_v25 }
  0x3c   :  { %448 = vmatprep.subr.bf16.mxu0 %v2213_v26 }
  0x3d   :  { %1708 = vmatpush3.bf16.msra.mxu1 %v2232_v29 }
  0x3e   :  { %1709 = vmatprep.subr.bf16.mxu1 %v2063_v10 }
  0x3f   :  { %449 = vmatpush1.bf16.msra.mxu0 %v2227_v28 }
  0x40   :  { %450 = vmatprep.subr.bf16.mxu0 %v2237_v30 }
  0x41   :  { %1710 = vmatpush3.bf16.msra.mxu1 %v2251_v32 }
  0x42   :  { %1711 = vmatprep.subr.bf16.mxu1 %v2063_v10 }
  0x43   :  { %451 = vmatpush1.bf16.msra.mxu0 %v2246_v31 }
  0x44   :  { %452 = vmatprep.subr.bf16.mxu0 %v2256_v33 }
  0x45   :  { %1712 = vmatpush3.bf16.msra.mxu1 %v2272_v35 }
  0x46   :  { %1713 = vmatprep.subr.bf16.mxu1 %v2063_v10 }
  0x47   :  { %453 = vmatpush1.bf16.msra.mxu0 %v2266_v34 }
  0x48   :  { %559 = vmatprep.subr.bf16.mxu0 %v2125_v9 }
  0x49   :  { %1714 = vmatpush3.bf16.msra.mxu1 %v2281_v36 }
  0x4a   :  { %1715 = vmatprep.subr.bf16.mxu1 %v2063_v10 }
  0x4d   :  { %1716 = vmatpush3.bf16.msra.mxu1 %v2290_v37 }
  0x4e   :  { %1721 = vmatprep.subr.bf16.mxu1 %v2063_v10 }
  0xdd   :  { %v2331_v38 = vpop.f32.mrb[0].mxu0 }
  0xde   :  { %v2333_v39 = vpop.f32.mrb[1].mxu0 }
  0xdf   :  { %v2335_v40 = vpop.f32.mrb[2].mxu0  ;;  %v2339_v42 = vpop.f32.mrb[0].mxu1 }
  0xe0   :  { %v2337_v41 = vpop.f32.mrb[3].mxu0  ;;  %v1679_v43 = vpop.f32.mrb[1].mxu1 }
  0xe1   :  { %v2341_v44 = vpop.f32.mrb[2].mxu1 }
  0xe2   :  { %v1680_v45 = vpop.f32.mrb[3].mxu1 }
  0xfd   :  { %v369_v46 = vpop.f32.mrb[4].mxu0 }
  0xfe   :  { %v416_v47 = vadd.f32 %v369_v46, %v2331_v38  ;;  %v371_v48 = vpop.f32.mrb[5].mxu0 }
  0xff   :  { %v423_v49 = vadd.f32 %v371_v48, %v2333_v39  ;;  %v373_v50 = vpop.f32.mrb[6].mxu0 }
 0x100   :  { %v1546_v51 = vmul.f32 -1.442695, %v416_v47  ;;  %v374_v52 = vpop.f32.mrb[7].mxu0 }
 0x101   :  { %v1547_v57 = vmul.f32 -1.442695, %v423_v49 }
 0x102   :  { %1941 = vpow2.f32 %v1546_v51 }
 0x103   :  { %v410_v53 = vpop.f32.mrb[4].mxu1  ;;  %1943 = vpow2.f32 %v1547_v57 }
 0x104   :  { %v1699_v54 = vpop.f32.mrb[5].mxu1  ;;  %v430_v61 = vadd.f32 %v2348_v60, %v410_v53 }
 0x105   :  { %v413_v55 = vpop.f32.mrb[6].mxu1 }
 0x106   :  { %v1700_v56 = vpop.f32.mrb[7].mxu1 }
 0x10c   :  { %v1942_v58 = vpop.eup %1941 }
 0x10d   :  { %v420_v59 = vadd.f32 1.0, %v1942_v58  ;;  %v1944_v62 = vpop.eup %1943 }
 0x10e   :  { %v427_v1 = vadd.f32 1.0, %v1944_v62 }
 0x10f   :  { %1945 = vrcp.f32 %v420_v59 }
 0x119   :  { %v1946_v63 = vpop.eup %1945 }
 0x11a   :  { %v431_v0 = vmul.f32 %v1946_v63, %v430_v61 }
 0x11c   :  { %v432_v2 = vadd.f32 %v431_v0, %v2339_v42 }
 0x11e   :  { %1947 = vtanh.f32 %v432_v2 }
 0x11f   :  { %1949 = vrcp.f32 %v427_v1 }
 0x128   :  { %v1948_v4 = vpop.eup %1947 }
 0x129   :  { %v434_v5 = vsub.f32 0.0, %v1948_v4  ;;  %v1950_v6 = vpop.eup %1949 }
 0x12b   :  { %v435_v7 = vmul.f32 %v1950_v6, %v434_v5 }
 0x12d   :  { %v2352_v8 = vadd.f32 %v1948_v4, %v435_v7 }
 0x12f   :  { %v437_v11 = vpack.c.bf16 %v2352_v8, %v2352_v8 }
 0x131   :  { %471 = vmatmul.mubr.bf16.vlgmr.msra.gmra.mrb[8].mxu0 %v437_v11  ;;  %1718 = vmatmul.mubr.bf16.vlgmr.msra.gmra.mrb[8].mxu1 %v437_v11 }
 0x132   :  { %560 = vmatpush1.bf16.msra.mxu0 %v2136_v12  ;;  %1722 = vmatpush3.bf16.msra.mxu1 %v2174_v20 }
 0x133   :  { %561 = vmatprep.subr.bf16.mxu0 %v2141_v13  ;;  %1723 = vmatprep.subr.bf16.mxu1 %v2063_v10 }
 0x134   :  { %591 = vmatprep.mubr.bf16.mxu0 %v2062_v3  ;;  %1737 = vmatprep.mubr.msk.bf16.mxu1 %vm2064_vm1, %v2063_v10 }
 0x136   :  { %562 = vmatpush1.bf16.msra.mxu0 %v2152_v15  ;;  %1724 = vmatpush3.bf16.msra.mxu1 %v2194_v23 }
 0x137   :  { %563 = vmatprep.subr.bf16.mxu0 %v2162_v17  ;;  %1725 = vmatprep.subr.bf16.mxu1 %v2063_v10 }
 0x13a   :  { %564 = vmatpush1.bf16.msra.mxu0 %v2168_v19  ;;  %1726 = vmatpush3.bf16.msra.mxu1 %v2218_v27 }
 0x13b   :  { %565 = vmatprep.subr.bf16.mxu0 %v2180_v21  ;;  %1727 = vmatprep.subr.bf16.mxu1 %v2063_v10 }
 0x13e   :  { %566 = vmatpush1.bf16.msra.mxu0 %v2186_v22  ;;  %1728 = vmatpush3.bf16.msra.mxu1 %v2232_v29 }
 0x13f   :  { %567 = vmatprep.subr.bf16.mxu0 %v2200_v24  ;;  %1729 = vmatprep.subr.bf16.mxu1 %v2063_v10 }
 0x142   :  { %568 = vmatpush1.bf16.msra.mxu0 %v2206_v25  ;;  %1730 = vmatpush3.bf16.msra.mxu1 %v2251_v32 }
 0x143   :  { %569 = vmatprep.subr.bf16.mxu0 %v2213_v26  ;;  %1731 = vmatprep.subr.bf16.mxu1 %v2063_v10 }
 0x146   :  { %570 = vmatpush1.bf16.msra.mxu0 %v2227_v28  ;;  %1732 = vmatpush3.bf16.msra.mxu1 %v2272_v35 }
 0x147   :  { %571 = vmatprep.subr.bf16.mxu0 %v2237_v30  ;;  %1733 = vmatprep.subr.bf16.mxu1 %v2063_v10 }
 0x14a   :  { %572 = vmatpush1.bf16.msra.mxu0 %v2246_v31  ;;  %1734 = vmatpush3.bf16.msra.mxu1 %v2281_v36 }
 0x14b   :  { %573 = vmatprep.subr.bf16.mxu0 %v2256_v33  ;;  %1735 = vmatprep.subr.bf16.mxu1 %v2063_v10 }
 0x14e   :  { %574 = vmatpush1.bf16.msra.mxu0 %v2266_v34  ;;  %1736 = vmatpush3.bf16.msra.mxu1 %v2290_v37 }
 0x14f   :  { %680 = vmatprep.subr.bf16.mxu0 %v2125_v9  ;;  %1741 = vmatprep.subr.bf16.mxu1 %v2063_v10 }
 0x204   :  { %v472_v14 = vpop.f32.mrb[8].mxu0  ;;  %v513_v16 = vpop.f32.mrb[8].mxu1 }
 0x205   :  { %v520_v18 = vrot.slane %v472_v14, 6  ;;  %v474_v43 = vpop.f32.mrb[9].mxu0  ;;  %v1719_v45 = vpop.f32.mrb[9].mxu1  ;;  %v539_v57 = vadd.f32 %v2348_v60, %v513_v16 }
 0x206   :  { %v530_v46 = vrot.slane %v474_v43, 6  ;;  %v476_v47 = vpop.f32.mrb[10].mxu0  ;;  %v516_v48 = vpop.f32.mrb[10].mxu1 }
 0x207   :  { %v522_v49 = vadd.f32 %v520_v18, %v2331_v38  ;;  %v477_v50 = vpop.f32.mrb[11].mxu0  ;;  %v1720_v51 = vpop.f32.mrb[11].mxu1  ;;  %v541_v58 = vrot.slane %v539_v57, 6 }
 0x208   :  { %v532_v52 = vadd.f32 %v530_v46, %v2333_v39 }
 0x209   :  { %v1548_v53 = vmul.f32 -1.442695, %v522_v49 }
 0x20a   :  { %v1549_v56 = vmul.f32 -1.442695, %v532_v52 }
 0x20b   :  { %1951 = vpow2.f32 %v1548_v53 }
 0x215   :  { %v1952_v54 = vpop.eup %1951 }
 0x216   :  { %v526_v55 = vadd.f32 1.0, %v1952_v54 }
 0x218   :  { %1953 = vrcp.f32 %v526_v55 }
 0x219   :  { %1955 = vpow2.f32 %v1549_v56 }
 0x222   :  { %v1954_v59 = vpop.eup %1953 }
 0x223   :  { %v543_v61 = vmul.f32 %v1954_v59, %v541_v58  ;;  %v1956_v63 = vpop.eup %1955 }
 0x224   :  { %v536_v0 = vadd.f32 1.0, %v1956_v63 }
 0x225   :  { %v544_v62 = vadd.f32 %v543_v61, %v2339_v42 }
 0x227   :  { %1957 = vtanh.f32 %v544_v62 }
 0x228   :  { %1959 = vrcp.f32 %v536_v0 }
 0x231   :  { %v1958_v1 = vpop.eup %1957 }
 0x232   :  { %v547_v2 = vrot.slane %v1958_v1, 2  ;;  %v1960_v6 = vpop.eup %1959 }
 0x234   :  { %v549_v4 = vsub.f32 %v2352_v8, %v547_v2 }
 0x236   :  { %v551_v5 = vrot.slane %v549_v4, 6 }
 0x238   :  { %v553_v7 = vmul.f32 %v1960_v6, %v551_v5 }
 0x23a   :  { %v2396_v11 = vadd.f32 %v1958_v1, %v553_v7 }
 0x23c   :  { %v555_v14 = vpack.c.bf16 %v2396_v11, %v2396_v11 }
 0x23e   :  { %v557_v16 = vrot.slane %v555_v14, 1 }
 0x240   :  { %592 = vmatmul.mubr.bf16.vlgmr.msra.gmra.mrb[12].mxu0 %v557_v16  ;;  %1738 = vmatmul.mubr.bf16.vlgmr.msra.gmra.mrb[12].mxu1 %v557_v16 }
 0x241   :  { %681 = vmatpush1.bf16.msra.mxu0 %v2136_v12  ;;  %1742 = vmatpush3.bf16.msra.mxu1 %v2174_v20 }
 0x242   :  { %682 = vmatprep.subr.bf16.mxu0 %v2141_v13  ;;  %1743 = vmatprep.subr.bf16.mxu1 %v2063_v10 }
 0x243   :  { %712 = vmatprep.mubr.bf16.mxu0 %v2062_v3  ;;  %1757 = vmatprep.mubr.msk.bf16.mxu1 %vm2064_vm1, %v2063_v10 }
 0x245   :  { %683 = vmatpush1.bf16.msra.mxu0 %v2152_v15  ;;  %1744 = vmatpush3.bf16.msra.mxu1 %v2194_v23 }
 0x246   :  { %684 = vmatprep.subr.bf16.mxu0 %v2162_v17  ;;  %1745 = vmatprep.subr.bf16.mxu1 %v2063_v10 }
 0x249   :  { %685 = vmatpush1.bf16.msra.mxu0 %v2168_v19  ;;  %1746 = vmatpush3.bf16.msra.mxu1 %v2218_v27 }
 0x24a   :  { %686 = vmatprep.subr.bf16.mxu0 %v2180_v21  ;;  %1747 = vmatprep.subr.bf16.mxu1 %v2063_v10 }
 0x24d   :  { %687 = vmatpush1.bf16.msra.mxu0 %v2186_v22  ;;  %1748 = vmatpush3.bf16.msra.mxu1 %v2232_v29 }
 0x24e   :  { %688 = vmatprep.subr.bf16.mxu0 %v2200_v24  ;;  %1749 = vmatprep.subr.bf16.mxu1 %v2063_v10 }
 0x251   :  { %689 = vmatpush1.bf16.msra.mxu0 %v2206_v25  ;;  %1750 = vmatpush3.bf16.msra.mxu1 %v2251_v32 }
 0x252   :  { %690 = vmatprep.subr.bf16.mxu0 %v2213_v26  ;;  %1751 = vmatprep.subr.bf16.mxu1 %v2063_v10 }
 0x255   :  { %691 = vmatpush1.bf16.msra.mxu0 %v2227_v28  ;;  %1752 = vmatpush3.bf16.msra.mxu1 %v2272_v35 }
 0x256   :  { %692 = vmatprep.subr.bf16.mxu0 %v2237_v30  ;;  %1753 = vmatprep.subr.bf16.mxu1 %v2063_v10 }
 0x259   :  { %693 = vmatpush1.bf16.msra.mxu0 %v2246_v31  ;;  %1754 = vmatpush3.bf16.msra.mxu1 %v2281_v36 }
 0x25a   :  { %694 = vmatprep.subr.bf16.mxu0 %v2256_v33  ;;  %1755 = vmatprep.subr.bf16.mxu1 %v2063_v10 }
 0x25d   :  { %695 = vmatpush1.bf16.msra.mxu0 %v2266_v34  ;;  %1756 = vmatpush3.bf16.msra.mxu1 %v2290_v37 }
 0x25e   :  { %801 = vmatprep.subr.bf16.mxu0 %v2125_v9  ;;  %1761 = vmatprep.subr.bf16.mxu1 %v2063_v10 }
 0x313   :  { %v593_v8 = vpop.f32.mrb[12].mxu0  ;;  %v634_v18 = vpop.f32.mrb[12].mxu1 }
 0x314   :  { %v641_v43 = vrot.slane %v593_v8, 4  ;;  %v595_v45 = vpop.f32.mrb[13].mxu0  ;;  %v1739_v46 = vpop.f32.mrb[13].mxu1  ;;  %v660_v58 = vadd.f32 %v2348_v60, %v634_v18 }
 0x315   :  { %v651_v47 = vrot.slane %v595_v45, 4  ;;  %v597_v48 = vpop.f32.mrb[14].mxu0  ;;  %v637_v49 = vpop.f32.mrb[14].mxu1 }
 0x316   :  { %v643_v50 = vadd.f32 %v641_v43, %v2331_v38  ;;  %v598_v51 = vpop.f32.mrb[15].mxu0  ;;  %v1740_v52 = vpop.f32.mrb[15].mxu1  ;;  %v662_v59 = vrot.slane %v660_v58, 4 }
 0x317   :  { %v653_v53 = vadd.f32 %v651_v47, %v2333_v39 }
 0x318   :  { %v1550_v54 = vmul.f32 -1.442695, %v643_v50 }
 0x319   :  { %v1551_v57 = vmul.f32 -1.442695, %v653_v53 }
 0x31a   :  { %1961 = vpow2.f32 %v1550_v54 }
 0x324   :  { %v1962_v55 = vpop.eup %1961 }
 0x325   :  { %v647_v56 = vadd.f32 1.0, %v1962_v55 }
 0x327   :  { %1963 = vrcp.f32 %v647_v56 }
 0x328   :  { %1965 = vpow2.f32 %v1551_v57 }
 0x331   :  { %v1964_v61 = vpop.eup %1963 }
 0x332   :  { %v664_v62 = vmul.f32 %v1964_v61, %v662_v59  ;;  %v1966_v0 = vpop.eup %1965 }
 0x333   :  { %v657_v1 = vadd.f32 1.0, %v1966_v0 }
 0x334   :  { %v665_v63 = vadd.f32 %v664_v62, %v2339_v42 }
 0x336   :  { %1967 = vtanh.f32 %v665_v63 }
 0x337   :  { %1969 = vrcp.f32 %v657_v1 }
 0x340   :  { %v1968_v2 = vpop.eup %1967 }
 0x341   :  { %v668_v4 = vrot.slane %v1968_v2, 2  ;;  %v1970_v7 = vpop.eup %1969 }
 0x343   :  { %v670_v5 = vsub.f32 %v2396_v11, %v668_v4 }
 0x345   :  { %v672_v6 = vrot.slane %v670_v5, 6 }
 0x347   :  { %v674_v14 = vmul.f32 %v1970_v7, %v672_v6 }
 0x349   :  { %v2440_v16 = vadd.f32 %v1968_v2, %v674_v14 }
 0x34b   :  { %v676_v8 = vpack.c.bf16 %v2440_v16, %v2440_v16 }
 0x34d   :  { %v678_v18 = vrot.slane %v676_v8, 2 }
 0x34f   :  { %713 = vmatmul.mubr.bf16.vlgmr.msra.gmra.mrb[16].mxu0 %v678_v18  ;;  %1758 = vmatmul.mubr.bf16.vlgmr.msra.gmra.mrb[16].mxu1 %v678_v18 }
 0x350   :  { %802 = vmatpush1.bf16.msra.mxu0 %v2136_v12  ;;  %1762 = vmatpush3.bf16.msra.mxu1 %v2174_v20 }
 0x351   :  { %803 = vmatprep.subr.bf16.mxu0 %v2141_v13  ;;  %1763 = vmatprep.subr.bf16.mxu1 %v2063_v10 }
 0x352   :  { %833 = vmatprep.mubr.bf16.mxu0 %v2062_v3  ;;  %1777 = vmatprep.mubr.msk.bf16.mxu1 %vm2064_vm1, %v2063_v10 }
 0x354   :  { %804 = vmatpush1.bf16.msra.mxu0 %v2152_v15  ;;  %1764 = vmatpush3.bf16.msra.mxu1 %v2194_v23 }
 0x355   :  { %805 = vmatprep.subr.bf16.mxu0 %v2162_v17  ;;  %1765 = vmatprep.subr.bf16.mxu1 %v2063_v10 }
 0x358   :  { %806 = vmatpush1.bf16.msra.mxu0 %v2168_v19  ;;  %1766 = vmatpush3.bf16.msra.mxu1 %v2218_v27 }
 0x359   :  { %807 = vmatprep.subr.bf16.mxu0 %v2180_v21  ;;  %1767 = vmatprep.subr.bf16.mxu1 %v2063_v10 }
 0x35c   :  { %808 = vmatpush1.bf16.msra.mxu0 %v2186_v22  ;;  %1768 = vmatpush3.bf16.msra.mxu1 %v2232_v29 }
 0x35d   :  { %809 = vmatprep.subr.bf16.mxu0 %v2200_v24  ;;  %1769 = vmatprep.subr.bf16.mxu1 %v2063_v10 }
 0x360   :  { %810 = vmatpush1.bf16.msra.mxu0 %v2206_v25  ;;  %1770 = vmatpush3.bf16.msra.mxu1 %v2251_v32 }
 0x361   :  { %811 = vmatprep.subr.bf16.mxu0 %v2213_v26  ;;  %1771 = vmatprep.subr.bf16.mxu1 %v2063_v10 }
 0x364   :  { %812 = vmatpush1.bf16.msra.mxu0 %v2227_v28  ;;  %1772 = vmatpush3.bf16.msra.mxu1 %v2272_v35 }
 0x365   :  { %813 = vmatprep.subr.bf16.mxu0 %v2237_v30  ;;  %1773 = vmatprep.subr.bf16.mxu1 %v2063_v10 }
 0x368   :  { %814 = vmatpush1.bf16.msra.mxu0 %v2246_v31  ;;  %1774 = vmatpush3.bf16.msra.mxu1 %v2281_v36 }
 0x369   :  { %815 = vmatprep.subr.bf16.mxu0 %v2256_v33  ;;  %1775 = vmatprep.subr.bf16.mxu1 %v2063_v10 }
 0x36c   :  { %816 = vmatpush1.bf16.msra.mxu0 %v2266_v34  ;;  %1776 = vmatpush3.bf16.msra.mxu1 %v2290_v37 }
 0x36d   :  { %910 = vmatprep.subr.bf16.mxu0 %v2125_v9  ;;  %1781 = vmatprep.subr.bf16.mxu1 %v2063_v10 }
 0x422   :  { %v714_v11 = vpop.f32.mrb[16].mxu0  ;;  %v755_v43 = vpop.f32.mrb[16].mxu1 }
 0x423   :  { %v762_v45 = vrot.slane %v714_v11, 2  ;;  %v716_v46 = vpop.f32.mrb[17].mxu0  ;;  %v1759_v47 = vpop.f32.mrb[17].mxu1  ;;  %v781_v59 = vadd.f32 %v2348_v60, %v755_v43 }
 0x424   :  { %v772_v48 = vrot.slane %v716_v46, 2  ;;  %v718_v49 = vpop.f32.mrb[18].mxu0  ;;  %v758_v50 = vpop.f32.mrb[18].mxu1 }
 0x425   :  { %v764_v51 = vadd.f32 %v762_v45, %v2331_v38  ;;  %v719_v52 = vpop.f32.mrb[19].mxu0  ;;  %v1760_v53 = vpop.f32.mrb[19].mxu1  ;;  %v783_v61 = vrot.slane %v781_v59, 2 }
 0x426   :  { %v774_v54 = vadd.f32 %v772_v48, %v2333_v39 }
 0x427   :  { %v1552_v55 = vmul.f32 -1.442695, %v764_v51 }
 0x428   :  { %v1553_v58 = vmul.f32 -1.442695, %v774_v54 }
 0x429   :  { %1971 = vpow2.f32 %v1552_v55 }
 0x433   :  { %v1972_v56 = vpop.eup %1971 }
 0x434   :  { %v768_v57 = vadd.f32 1.0, %v1972_v56 }
 0x436   :  { %1973 = vrcp.f32 %v768_v57 }
 0x437   :  { %1975 = vpow2.f32 %v1553_v58 }
 0x440   :  { %v1974_v62 = vpop.eup %1973 }
 0x441   :  { %v785_v63 = vmul.f32 %v1974_v62, %v783_v61  ;;  %v1976_v1 = vpop.eup %1975 }
 0x442   :  { %v778_v38 = vadd.f32 1.0, %v1976_v1 }
 0x443   :  { %v786_v0 = vadd.f32 %v785_v63, %v2339_v42 }
 0x445   :  { %1977 = vtanh.f32 %v786_v0 }
 0x446   :  { %1979 = vrcp.f32 %v778_v38 }
 0x44f   :  { %v1978_v2 = vpop.eup %1977 }
 0x450   :  { %v789_v39 = vrot.slane %v1978_v2, 2  ;;  %v1980_v6 = vpop.eup %1979 }
 0x452   :  { %v791_v4 = vsub.f32 %v2440_v16, %v789_v39 }
 0x454   :  { %v793_v5 = vrot.slane %v791_v4, 6 }
 0x456   :  { %v795_v7 = vmul.f32 %v1980_v6, %v793_v5 }
 0x458   :  { %v2484_v14 = vadd.f32 %v1978_v2, %v795_v7 }
 0x45a   :  { %v797_v8 = vpack.c.bf16 %v2484_v14, %v2484_v14 }
 0x45c   :  { %v799_v18 = vrot.slane %v797_v8, 3 }
 0x45e   :  { %834 = vmatmul.mubr.bf16.vlgmr.msra.gmra.mrb[20].mxu0 %v799_v18  ;;  %1778 = vmatmul.mubr.bf16.vlgmr.msra.gmra.mrb[20].mxu1 %v799_v18 }
 0x45f   :  { %911 = vmatpush1.bf16.msra.mxu0 %v2136_v12  ;;  %1782 = vmatpush3.bf16.msra.mxu1 %v2174_v20 }
 0x460   :  { %912 = vmatprep.subr.bf16.mxu0 %v2141_v13  ;;  %1783 = vmatprep.subr.bf16.mxu1 %v2063_v10 }
 0x461   :  { %942 = vmatprep.mubr.bf16.mxu0 %v2062_v3  ;;  %1797 = vmatprep.mubr.msk.bf16.mxu1 %vm2064_vm1, %v2063_v10 }
 0x463   :  { %913 = vmatpush1.bf16.msra.mxu0 %v2152_v15  ;;  %1784 = vmatpush3.bf16.msra.mxu1 %v2194_v23 }
 0x464   :  { %914 = vmatprep.subr.bf16.mxu0 %v2162_v17  ;;  %1785 = vmatprep.subr.bf16.mxu1 %v2063_v10 }
 0x467   :  { %915 = vmatpush1.bf16.msra.mxu0 %v2168_v19  ;;  %1786 = vmatpush3.bf16.msra.mxu1 %v2218_v27 }
 0x468   :  { %916 = vmatprep.subr.bf16.mxu0 %v2180_v21  ;;  %1787 = vmatprep.subr.bf16.mxu1 %v2063_v10 }
 0x46b   :  { %917 = vmatpush1.bf16.msra.mxu0 %v2186_v22  ;;  %1788 = vmatpush3.bf16.msra.mxu1 %v2232_v29 }
 0x46c   :  { %918 = vmatprep.subr.bf16.mxu0 %v2200_v24  ;;  %1789 = vmatprep.subr.bf16.mxu1 %v2063_v10 }
 0x46f   :  { %919 = vmatpush1.bf16.msra.mxu0 %v2206_v25  ;;  %1790 = vmatpush3.bf16.msra.mxu1 %v2251_v32 }
 0x470   :  { %920 = vmatprep.subr.bf16.mxu0 %v2213_v26  ;;  %1791 = vmatprep.subr.bf16.mxu1 %v2063_v10 }
 0x473   :  { %921 = vmatpush1.bf16.msra.mxu0 %v2227_v28  ;;  %1792 = vmatpush3.bf16.msra.mxu1 %v2272_v35 }
 0x474   :  { %922 = vmatprep.subr.bf16.mxu0 %v2237_v30  ;;  %1793 = vmatprep.subr.bf16.mxu1 %v2063_v10 }
 0x477   :  { %923 = vmatpush1.bf16.msra.mxu0 %v2246_v31  ;;  %1794 = vmatpush3.bf16.msra.mxu1 %v2281_v36 }
 0x478   :  { %924 = vmatprep.subr.bf16.mxu0 %v2256_v33  ;;  %1795 = vmatprep.subr.bf16.mxu1 %v2063_v10 }
 0x47b   :  { %925 = vmatpush1.bf16.msra.mxu0 %v2266_v34  ;;  %1796 = vmatpush3.bf16.msra.mxu1 %v2290_v37 }
 0x47c   :  { %1031 = vmatprep.subr.bf16.mxu0 %v2125_v9  ;;  %1801 = vmatprep.subr.bf16.mxu1 %v2063_v10 }
 0x531   :  { %v835_v42 = vpop.f32.mrb[20].mxu0  ;;  %v876_v16 = vpop.f32.mrb[20].mxu1 }
 0x532   :  { %v882_v11 = vadd.f32 %v835_v42, %v2335_v40  ;;  %v837_v43 = vpop.f32.mrb[21].mxu0  ;;  %v1779_v45 = vpop.f32.mrb[21].mxu1  ;;  %v896_v54 = vadd.f32 %v2348_v60, %v876_v16 }
 0x533   :  { %v889_v46 = vadd.f32 %v837_v43, %v2337_v41  ;;  %v839_v47 = vpop.f32.mrb[22].mxu0  ;;  %v879_v48 = vpop.f32.mrb[22].mxu1 }
 0x534   :  { %v1554_v49 = vmul.f32 -1.442695, %v882_v11  ;;  %v840_v50 = vpop.f32.mrb[23].mxu0  ;;  %v1780_v51 = vpop.f32.mrb[23].mxu1 }
 0x535   :  { %v1555_v9 = vmul.f32 -1.442695, %v889_v46 }
 0x536   :  { %1981 = vpow2.f32 %v1554_v49 }
 0x540   :  { %v1982_v52 = vpop.eup %1981 }
 0x541   :  { %v886_v53 = vadd.f32 1.0, %v1982_v52  ;;  %v2022_v52 = vld [vmem:[%s2745_s2] ss:$12 sps:$4 sm:$0xff]  }
 0x543   :  { %1983 = vrcp.f32 %v886_v53  ;;  %v2023_v53 = vld [vmem:[%s2745_s2 + $0x8] ss:$12 sps:$4 sm:$0xff]  }
 0x544   :  { %1985 = vpow2.f32 %v1555_v9  ;;  %v2024_v9 = vld [vmem:[%s2745_s2 + $0x1c] ss:$12 sps:$4 sm:$0xff]  }
 0x54d   :  { %v1984_v55 = vpop.eup %1983 }
 0x54e   :  { %v897_v56 = vmul.f32 %v1984_v55, %v896_v54  ;;  %v1986_v58 = vpop.eup %1985  ;;  %v2025_v54 = vld [vmem:[%s2745_s2 + $0x18] ss:$12 sps:$4 sm:$0xff]   ;;  %v2026_v55 = vld [vmem:[%s2745_s2 + $0x20] ss:$12 sps:$4 sm:$0xff]  }
 0x54f   :  { %v893_v59 = vadd.f32 1.0, %v1986_v58  ;;  %v2030_v58 = vld [vmem:[%s2745_s2 + $0x4c] ss:$12 sps:$4 sm:$0xff]  }
 0x550   :  { %v898_v57 = vadd.f32 %v897_v56, %v2341_v44  ;;  %v2027_v56 = vld [vmem:[%s2745_s2 + $0x34] ss:$12 sps:$4 sm:$0xff]  }
 0x552   :  { %1987 = vtanh.f32 %v898_v57  ;;  %v2029_v57 = vld [vmem:[%s2745_s2 + $0x38] ss:$12 sps:$4 sm:$0xff]  }
 0x553   :  { %1989 = vrcp.f32 %v893_v59  ;;  %v2031_v59 = vld [vmem:[%s2745_s2 + $0x48] ss:$12 sps:$4 sm:$0xff]  }
 0x55c   :  { %v1988_v61 = vpop.eup %1987 }
 0x55d   :  { %v901_v62 = vrot.slane %v1988_v61, 2  ;;  %v1990_v1 = vpop.eup %1989 }
 0x55f   :  { %v903_v63 = vsub.f32 %v2484_v14, %v901_v62  ;;  %v2033_v62 = vld [vmem:[%s2745_s2 + $0x60] ss:$12 sps:$4 sm:$0xff]  }
 0x561   :  { %v905_v0 = vrot.slane %v903_v63, 6  ;;  %v2034_v63 = vld [vmem:[%s2745_s2 + $0x7c] ss:$12 sps:$4 sm:$0xff]  }
 0x563   :  { %v907_v38 = vmul.f32 %v1990_v1, %v905_v0  ;;  %v2036_v0 = vld [vmem:[%s2745_s2 + $0x94] ss:$12 sps:$4 sm:$0xff]  }
 0x565   :  { %v2528_v2 = vadd.f32 %v1988_v61, %v907_v38  ;;  %v2032_v61 = vld [vmem:[%s2745_s2 + $0x64] ss:$12 sps:$4 sm:$0xff]  }
 0x567   :  { %v909_v39 = vpack.c.bf16 %v2528_v2, %v2528_v2 }
 0x569   :  { %943 = vmatmul.mubr.bf16.vlgmr.msra.gmra.mrb[24].mxu0 %v909_v39  ;;  %1798 = vmatmul.mubr.bf16.vlgmr.msra.gmra.mrb[24].mxu1 %v909_v39 }
 0x56a   :  { %1032 = vmatpush1.bf16.msra.mxu0 %v2136_v12  ;;  %1802 = vmatpush3.bf16.msra.mxu1 %v2174_v20  ;;  %v2021_v12 = vld [vmem:[%s2745_s2 + $0x4] ss:$12 sps:$4 sm:$0xff]  }
 0x56b   :  { %1033 = vmatprep.subr.bf16.mxu0 %v2141_v13  ;;  %1803 = vmatprep.subr.bf16.mxu1 %v2063_v10 }
 0x56c   :  { %1063 = vmatprep.mubr.bf16.mxu0 %v2062_v3  ;;  %1817 = vmatprep.mubr.msk.bf16.mxu1 %vm2064_vm1, %v2063_v10 }
 0x56e   :  { %1034 = vmatpush1.bf16.msra.mxu0 %v2152_v15  ;;  %1804 = vmatpush3.bf16.msra.mxu1 %v2194_v23 }
 0x56f   :  { %1035 = vmatprep.subr.bf16.mxu0 %v2162_v17  ;;  %1805 = vmatprep.subr.bf16.mxu1 %v2063_v10 }
 0x572   :  { %1036 = vmatpush1.bf16.msra.mxu0 %v2168_v19  ;;  %1806 = vmatpush3.bf16.msra.mxu1 %v2218_v27 }
 0x573   :  { %1037 = vmatprep.subr.bf16.mxu0 %v2180_v21  ;;  %1807 = vmatprep.subr.bf16.mxu1 %v2063_v10 }
 0x576   :  { %1038 = vmatpush1.bf16.msra.mxu0 %v2186_v22  ;;  %1808 = vmatpush3.bf16.msra.mxu1 %v2232_v29 }
 0x577   :  { %1039 = vmatprep.subr.bf16.mxu0 %v2200_v24  ;;  %1809 = vmatprep.subr.bf16.mxu1 %v2063_v10 }
 0x57a   :  { %1040 = vmatpush1.bf16.msra.mxu0 %v2206_v25  ;;  %1810 = vmatpush3.bf16.msra.mxu1 %v2251_v32 }
 0x57b   :  { %1041 = vmatprep.subr.bf16.mxu0 %v2213_v26  ;;  %1811 = vmatprep.subr.bf16.mxu1 %v2063_v10 }
 0x57e   :  { %1042 = vmatpush1.bf16.msra.mxu0 %v2227_v28  ;;  %1812 = vmatpush3.bf16.msra.mxu1 %v2272_v35 }
 0x57f   :  { %1043 = vmatprep.subr.bf16.mxu0 %v2237_v30  ;;  %1813 = vmatprep.subr.bf16.mxu1 %v2063_v10 }
 0x582   :  { %1044 = vmatpush1.bf16.msra.mxu0 %v2246_v31  ;;  %1814 = vmatpush3.bf16.msra.mxu1 %v2281_v36 }
 0x583   :  { %1045 = vmatprep.subr.bf16.mxu0 %v2256_v33  ;;  %1815 = vmatprep.subr.bf16.mxu1 %v2063_v10 }
 0x586   :  { %1046 = vmatpush1.bf16.msra.mxu0 %v2266_v34  ;;  %1816 = vmatpush3.bf16.msra.mxu1 %v2290_v37 }
 0x587   :  { %1152 = vmatprep.subr.bf16.mxu0 %v2021_v12  ;;  %1821 = vmatprep.subr.bf16.mxu1 %v2063_v10 }
 0x63c   :  { %v944_v13 = vpop.f32.mrb[24].mxu0  ;;  %v985_v15 = vpop.f32.mrb[24].mxu1 }
 0x63d   :  { %v992_v17 = vrot.slane %v944_v13, 6  ;;  %v946_v19 = vpop.f32.mrb[25].mxu0  ;;  %v1799_v20 = vpop.f32.mrb[25].mxu1  ;;  %v1011_v6 = vadd.f32 %v2348_v60, %v985_v15 }
 0x63e   :  { %v1002_v21 = vrot.slane %v946_v19, 6  ;;  %v948_v22 = vpop.f32.mrb[26].mxu0  ;;  %v988_v23 = vpop.f32.mrb[26].mxu1 }
 0x63f   :  { %v994_v24 = vadd.f32 %v992_v17, %v2335_v40  ;;  %v949_v25 = vpop.f32.mrb[27].mxu0  ;;  %v1800_v26 = vpop.f32.mrb[27].mxu1  ;;  %v1013_v7 = vrot.slane %v1011_v6, 6 }
 0x640   :  { %v1004_v27 = vadd.f32 %v1002_v21, %v2337_v41 }
 0x641   :  { %v1556_v28 = vmul.f32 -1.442695, %v994_v24 }
 0x642   :  { %v1557_v5 = vmul.f32 -1.442695, %v1004_v27 }
 0x643   :  { %1991 = vpow2.f32 %v1556_v28 }
 0x64d   :  { %v1992_v30 = vpop.eup %1991 }
 0x64e   :  { %v998_v4 = vadd.f32 1.0, %v1992_v30 }
 0x650   :  { %1993 = vrcp.f32 %v998_v4 }
 0x651   :  { %1995 = vpow2.f32 %v1557_v5 }
 0x65a   :  { %v1994_v14 = vpop.eup %1993 }
 0x65b   :  { %v1015_v8 = vmul.f32 %v1994_v14, %v1013_v7  ;;  %v1996_v42 = vpop.eup %1995 }
 0x65c   :  { %v1008_v16 = vadd.f32 1.0, %v1996_v42  ;;  %v1927_v42 = vld [vmem:[%s2747_s4 + $0x10] sm:$0xff]  }
 0x65d   :  { %v1016_v18 = vadd.f32 %v1015_v8, %v2341_v44  ;;  %v1925_v8 = vld [vmem:[%s2747_s4] sm:$0xff]  }
 0x65f   :  { %1997 = vtanh.f32 %v1016_v18  ;;  %v1926_v18 = vld [vmem:[%s2747_s4 + $0x8] sm:$0xff]  }
 0x660   :  { %1999 = vrcp.f32 %v1008_v16  ;;  %v1928_v16 = vld [vmem:[%s2747_s4 + $0x18] sm:$0xff]  }
 0x669   :  { %v1998_v11 = vpop.eup %1997 }
 0x66a   :  { %v1019_v43 = vrot.slane %v1998_v11, 2  ;;  %v2000_v47 = vpop.eup %1999 }
 0x66c   :  { %v1021_v45 = vsub.f32 %v2528_v2, %v1019_v43  ;;  %v1930_v43 = vld [vmem:[%s2747_s4 + $0x28] sm:$0xff]  }
 0x66e   :  { %v1023_v46 = vrot.slane %v1021_v45, 6  ;;  %v1931_v45 = vld [vmem:[%s2747_s4 + $0x30] sm:$0xff]  }
 0x670   :  { %v1025_v48 = vmul.f32 %v2000_v47, %v1023_v46  ;;  %v1932_v46 = vld [vmem:[%s2747_s4 + $0x38] sm:$0xff]   ;;  %v1933_v47 = vld [vmem:[%s2749_s6] sm:$0xff]  }
 0x672   :  { %v2574_v49 = vadd.f32 %v1998_v11, %v1025_v48  ;;  %v1929_v11 = vld [vmem:[%s2747_s4 + $0x20] sm:$0xff]   ;;  %v1934_v48 = vld [vmem:[%s2749_s6 + $0x8] sm:$0xff]  }
 0x674   :  { %v1027_v50 = vpack.c.bf16 %v2574_v49, %v2574_v49 }
 0x676   :  { %v1029_v51 = vrot.slane %v1027_v50, 1  ;;  %v1936_v50 = vld [vmem:[%s2749_s6 + $0x18] sm:$0xff]  }
 0x678   :  { %1064 = vmatmul.mubr.bf16.vlgmr.msra.gmra.mrb[28].mxu0 %v1029_v51  ;;  %1818 = vmatmul.mubr.bf16.vlgmr.msra.gmra.mrb[28].mxu1 %v1029_v51  ;;  %v1937_v51 = vld [vmem:[%s2749_s6 + $0x20] sm:$0xff]  }
 0x679   :  { %1153 = vmatpush1.bf16.msra.mxu0 %v2022_v52  ;;  %1822 = vmatpush3.bf16.msra.mxu1 %v2023_v53  ;;  %v1938_v52 = vld [vmem:[%s2749_s6 + $0x28] sm:$0xff]  }
 0x67a   :  { %1154 = vmatprep.subr.bf16.mxu0 %v2024_v9  ;;  %1823 = vmatprep.subr.bf16.mxu1 %v2063_v10 }
 0x67b   :  { %1184 = vmatprep.mubr.bf16.mxu0 %v2062_v3  ;;  %1837 = vmatprep.mubr.msk.bf16.mxu1 %vm2064_vm1, %v2063_v10  ;;  %v2028_v3 = vld [vmem:[%s2745_s2 + $0x30] ss:$12 sps:$4 sm:$0xff]  }
 0x67d   :  { %1155 = vmatpush1.bf16.msra.mxu0 %v2025_v54  ;;  %1824 = vmatpush3.bf16.msra.mxu1 %v2026_v55 }
 0x67e   :  { %1156 = vmatprep.subr.bf16.mxu0 %v2027_v56  ;;  %1825 = vmatprep.subr.bf16.mxu1 %v2063_v10 }
 0x681   :  { %1157 = vmatpush1.bf16.msra.mxu0 %v2028_v3  ;;  %1826 = vmatpush3.bf16.msra.mxu1 %v2029_v57 }
 0x682   :  { %1158 = vmatprep.subr.bf16.mxu0 %v2030_v58  ;;  %1827 = vmatprep.subr.bf16.mxu1 %v2063_v10 }
 0x685   :  { %1159 = vmatpush1.bf16.msra.mxu0 %v2031_v59  ;;  %1828 = vmatpush3.bf16.msra.mxu1 %v2232_v29  ;;  %v2035_v29 = vld [vmem:[%s2745_s2 + $0x78] ss:$12 sps:$4 sm:$0xff]  }
 0x686   :  { %1160 = vmatprep.subr.bf16.mxu0 %v2032_v61  ;;  %1829 = vmatprep.subr.bf16.mxu1 %v2063_v10 }
 0x689   :  { %1161 = vmatpush1.bf16.msra.mxu0 %v2033_v62  ;;  %1830 = vmatpush3.bf16.msra.mxu1 %v2251_v32 }
 0x68a   :  { %1162 = vmatprep.subr.bf16.mxu0 %v2034_v63  ;;  %1831 = vmatprep.subr.bf16.mxu1 %v2063_v10 }
 0x68d   :  { %1163 = vmatpush1.bf16.msra.mxu0 %v2035_v29  ;;  %1832 = vmatpush3.bf16.msra.mxu1 %v2272_v35 }
 0x68e   :  { %1164 = vmatprep.subr.bf16.mxu0 %v2036_v0  ;;  %1833 = vmatprep.subr.bf16.mxu1 %v2063_v10 }
 0x691   :  { %1165 = vmatpush1.bf16.msra.mxu0 %v2246_v31  ;;  %1834 = vmatpush3.bf16.msra.mxu1 %v2281_v36 }
 0x692   :  { %1166 = vmatprep.subr.bf16.mxu0 %v2256_v33  ;;  %1835 = vmatprep.subr.bf16.mxu1 %v2063_v10 }
 0x695   :  { %1167 = vmatpush1.bf16.msra.mxu0 %v2266_v34  ;;  %1836 = vmatpush3.bf16.msra.mxu1 %v2290_v37 }
 0x696   :  { %1841 = vmatprep.subr.bf16.mxu0 %v2063_v10  ;;  %1861 = vmatprep.subr.bf16.mxu1 %v2063_v10 }
 0x74b   :  { %v1065_v32 = vpop.f32.mrb[28].mxu0  ;;  %v1106_v35 = vpop.f32.mrb[28].mxu1 }
 0x74c   :  { %v1113_v1 = vrot.slane %v1065_v32, 4  ;;  %v1067_v38 = vpop.f32.mrb[29].mxu0  ;;  %v1819_v2 = vpop.f32.mrb[29].mxu1  ;;  %v1132_v20 = vadd.f32 %v2348_v60, %v1106_v35 }
 0x74d   :  { %v1123_v31 = vrot.slane %v1067_v38, 4  ;;  %v1069_v39 = vpop.f32.mrb[30].mxu0  ;;  %v1109_v36 = vpop.f32.mrb[30].mxu1 }
 0x74e   :  { %v1115_v33 = vadd.f32 %v1113_v1, %v2335_v40  ;;  %v1070_v12 = vpop.f32.mrb[31].mxu0  ;;  %v1820_v13 = vpop.f32.mrb[31].mxu1  ;;  %v1134_v21 = vrot.slane %v1132_v20, 4  ;;  %v2037_v1 = vld [vmem:[%s2746_s3] ss:$0 sm:$0xff] }
 0x74f   :  { %v1125_v34 = vadd.f32 %v1123_v31, %v2337_v41 }
 0x750   :  { %v1558_v15 = vmul.f32 -1.442695, %v1115_v33 }
 0x751   :  { %v1559_v19 = vmul.f32 -1.442695, %v1125_v34 }
 0x752   :  { %2001 = vpow2.f32 %v1558_v15 }
 0x75c   :  { %v2002_v37 = vpop.eup %2001 }
 0x75d   :  { %v1119_v17 = vadd.f32 1.0, %v2002_v37 }
 0x75f   :  { %2003 = vrcp.f32 %v1119_v17 }
 0x760   :  { %2005 = vpow2.f32 %v1559_v19 }
 0x769   :  { %v2004_v22 = vpop.eup %2003 }
 0x76a   :  { %v1136_v23 = vmul.f32 %v2004_v22, %v1134_v21  ;;  %v2006_v25 = vpop.eup %2005  ;;  %v1939_v21 = vld [vmem:[%s2749_s6 + $0x30] sm:$0xff]   ;;  %v1562_v22 = vld [vmem:[%s2748_s5] ss:$0 sm:$0xff]  ;;  %s2038_s5 = scalar_lea.vmem %s1505_s14, 32 }
 0x76b   :  { %v1129_v26 = vadd.f32 1.0, %v2006_v25  ;;  %p2039_p0 = scmp.ne.s32.totalorder %s1505_s14, %s2038_s5  ;;  %p2044_p2 = scmp.lt.s32.totalorder %s2038_s5, %s2038_s5 }
 0x76c   :  { %v1137_v24 = vadd.f32 %v1136_v23, %v2341_v44 }
 0x76d   :  { %p2045_p3 = por %p2044_p2, %p2043_p1 }
 0x76e   :  { %2007 = vtanh.f32 %v1137_v24 }
 0x76f   :  { %2009 = vrcp.f32 %v1129_v26  ;;  %p2046_p4 = pnand %p2045_p3, %p2039_p0 }
 0x778   :  { %v2008_v27 = vpop.eup %2007 }
 0x779   :  { %v1140_v28 = vrot.slane %v2008_v27, 2  ;;  %v2010_v5 = vpop.eup %2009 }
 0x77b   :  { %v1142_v30 = vsub.f32 %v2574_v49, %v1140_v28  ;;  %v1935_v49 = vld [vmem:[%s2749_s6 + $0x10] sm:$0xff]  }
 0x77d   :  { %v1144_v4 = vrot.slane %v1142_v30, 6 }
 0x77f   :  { %v1146_v6 = vmul.f32 %v2010_v5, %v1144_v4 }
 0x781   :  { %v2648_v7 = vadd.f32 %v2008_v27, %v1146_v6 }
 0x783   :  { %v1148_v60 = vpack.c.bf16 %v2648_v7, %v2648_v7 }
 0x785   :  { %v1150_v14 = vrot.slane %v1148_v60, 2 }
 0x787   :  { %1185 = vmatmul.mubr.bf16.vlgmr.msra.gmra.mrb[32].mxu0 %v1150_v14  ;;  %1838 = vmatmul.mubr.bf16.vlgmr.msra.gmra.mrb[32].mxu1 %v1150_v14 }
 0x788   :  { %1857 = vmatprep.mubr.msk.bf16.mxu0 %vm2064_vm1, %v2063_v10  ;;  %1877 = vmatprep.mubr.msk.bf16.mxu1 %vm2064_vm1, %v2063_v10 }
 0x789   :  { %1842 = vmatpush3.bf16.msra.mxu0 %v1925_v8  ;;  %1862 = vmatpush3.bf16.msra.mxu1 %v1933_v47 }
 0x78a   :  { %1843 = vmatprep.subr.bf16.mxu0 %v2063_v10  ;;  %1863 = vmatprep.subr.bf16.mxu1 %v2063_v10 }
 0x78d   :  { %1844 = vmatpush3.bf16.msra.mxu0 %v1926_v18  ;;  %1864 = vmatpush3.bf16.msra.mxu1 %v1934_v48 }
 0x78e   :  { %1845 = vmatprep.subr.bf16.mxu0 %v2063_v10  ;;  %1865 = vmatprep.subr.bf16.mxu1 %v2063_v10 }
 0x791   :  { %1846 = vmatpush3.bf16.msra.mxu0 %v1927_v42  ;;  %1866 = vmatpush3.bf16.msra.mxu1 %v1935_v49 }
 0x792   :  { %1847 = vmatprep.subr.bf16.mxu0 %v2063_v10  ;;  %1867 = vmatprep.subr.bf16.mxu1 %v2063_v10 }
 0x795   :  { %1848 = vmatpush3.bf16.msra.mxu0 %v1928_v16  ;;  %1868 = vmatpush3.bf16.msra.mxu1 %v1936_v50 }
 0x796   :  { %1849 = vmatprep.subr.bf16.mxu0 %v2063_v10  ;;  %1869 = vmatprep.subr.bf16.mxu1 %v2063_v10 }
 0x799   :  { %1850 = vmatpush3.bf16.msra.mxu0 %v1929_v11  ;;  %1870 = vmatpush3.bf16.msra.mxu1 %v1937_v51 }
 0x79a   :  { %1851 = vmatprep.subr.bf16.mxu0 %v2063_v10  ;;  %1871 = vmatprep.subr.bf16.mxu1 %v2063_v10 }
 0x79d   :  { %1852 = vmatpush3.bf16.msra.mxu0 %v1930_v43  ;;  %1872 = vmatpush3.bf16.msra.mxu1 %v1938_v52 }
 0x79e   :  { %1853 = vmatprep.subr.bf16.mxu0 %v2063_v10  ;;  %1873 = vmatprep.subr.bf16.mxu1 %v2063_v10 }
 0x7a1   :  { %1854 = vmatpush3.bf16.msra.mxu0 %v1931_v45  ;;  %1874 = vmatpush3.bf16.msra.mxu1 %v1939_v21 }
 0x7a2   :  { %1855 = vmatprep.subr.bf16.mxu0 %v2063_v10  ;;  %1875 = vmatprep.subr.bf16.mxu1 %v2063_v10  ;;  %v1571_v10 = vld [vmem:[%s2750_s7] ss:$0 sm:$0xff] }
 0x7a5   :  { %1856 = vmatpush3.bf16.msra.mxu0 %v1932_v46 }
 0x85a   :  { %v1186_v53 = vpop.f32.mrb[32].mxu0  ;;  %v1227_v9 = vpop.f32.mrb[32].mxu1 }
 0x85b   :  { %v1234_v54 = vrot.slane %v1186_v53, 2  ;;  %v1188_v55 = vpop.f32.mrb[33].mxu0  ;;  %v1839_v56 = vpop.f32.mrb[33].mxu1  ;;  %v1253_v38 = vadd.f32 %v2037_v1, %v1227_v9 }
 0x85c   :  { %v1244_v3 = vrot.slane %v1188_v55, 2  ;;  %v1190_v57 = vpop.f32.mrb[34].mxu0  ;;  %v1230_v58 = vpop.f32.mrb[34].mxu1 }
 0x85d   :  { %v1236_v59 = vadd.f32 %v1234_v54, %v2335_v40  ;;  %v1191_v61 = vpop.f32.mrb[35].mxu0  ;;  %v1840_v62 = vpop.f32.mrb[35].mxu1  ;;  %v1255_v2 = vrot.slane %v1253_v38, 2 }
 0x85e   :  { %v1246_v63 = vadd.f32 %v1244_v3, %v2337_v41 }
 0x85f   :  { %v1560_v29 = vmul.f32 -1.442695, %v1236_v59 }
 0x860   :  { %v1561_v35 = vmul.f32 -1.442695, %v1246_v63 }
 0x861   :  { %2011 = vpow2.f32 %v1560_v29 }
 0x86b   :  { %v2012_v0 = vpop.eup %2011 }
 0x86c   :  { %v1240_v32 = vadd.f32 1.0, %v2012_v0 }
 0x86e   :  { %2013 = vrcp.f32 %v1240_v32 }
 0x86f   :  { %2015 = vpow2.f32 %v1561_v35 }
 0x878   :  { %v2014_v31 = vpop.eup %2013 }
 0x879   :  { %v1257_v39 = vmul.f32 %v2014_v31, %v1255_v2  ;;  %v2016_v36 = vpop.eup %2015 }
 0x87a   :  { %v1250_v41 = vadd.f32 1.0, %v2016_v36 }
 0x87b   :  { %v1258_v40 = vadd.f32 %v1257_v39, %v2341_v44  ;;  %v1940_v44 = vld [vmem:[%s2749_s6 + $0x38] sm:$0xff]  }
 0x87c   :  { %1876 = vmatpush3.bf16.msra.mxu1 %v1940_v44 }
 0x87d   :  { %2017 = vtanh.f32 %v1258_v40 }
 0x87e   :  { %2019 = vrcp.f32 %v1250_v41 }
 0x887   :  { %v2018_v33 = vpop.eup %2017 }
 0x888   :  { %v1261_v12 = vrot.slane %v2018_v33, 2  ;;  %v2020_v15 = vpop.eup %2019 }
 0x88a   :  { %v1263_v13 = vsub.f32 %v2648_v7, %v1261_v12 }
 0x88c   :  { %v1265_v34 = vrot.slane %v1263_v13, 6 }
 0x88e   :  { %v1267_v37 = vmul.f32 %v2020_v15, %v1265_v34 }
 0x890   :  { %v1268_v17 = vadd.f32 %v2018_v33, %v1267_v37 }
 0x892   :  { %v1269_v19 = vpack.c.bf16 %v1268_v17, %v1268_v17 }
 0x894   :  { %v1294_v20 = vrot.slane %v1269_v19, 3 }
 0x896   :  { %1858 = vmatmul.mubr.bf16.vlgmr.msra.gmra.mrb[36].mxu0 %v1294_v20 }
 0x969   :  { %v1378_v23 = vpop.f32.mrb[36].mxu0 }
 0x96a   :  { %v1379_v24 = vadd.f32 %v1562_v22, %v1378_v23  ;;  %v1859_v25 = vpop.f32.mrb[37].mxu0 }
 0x96b   :  { %v1381_v26 = vpop.f32.mrb[38].mxu0 }
 0x96c   :  { %v1384_v27 = vmax.f32 %v1379_v24, 0.0  ;;  %v1860_v28 = vpop.f32.mrb[39].mxu0 }
 0x96e   :  { %v1385_v30 = vpack.c.bf16 %v1384_v27, %v1384_v27 }
 0x970   :  { %1878 = vmatmul.mubr.bf16.vlgmr.msra.gmra.mrb[36].mxu1 %v1385_v30 }
 0xa43   :  { %v1491_v4 = vpop.f32.mrb[36].mxu1 }
 0xa44   :  { %v1492_v5 = vadd.f32 %v1571_v10, %v1491_v4  ;;  %v1879_v6 = vpop.f32.mrb[37].mxu1 }
 0xa45   :  { %v1494_v7 = vpop.f32.mrb[38].mxu1 }
 0xa46   :  { %1497 = vst [vmem:[#allocation2] sm:$0x3] %v1492_v5  ;;  %v1880_v60 = vpop.f32.mrb[39].mxu1 }
 0xa47   :  { %2049 = shalt.err (!%p2046_p4)
}
 0xa48   :  { %s2050_s7 = scalar_lea.hbm %s2751_s8, 32 }
 0xa49   :  { %p2051_p5 = scmp.ne.s32.totalorder %s2751_s8, %s2050_s7  ;;  %p2054_p6 = scmp.lt.u32.totalorder %s2050_s7, %s2751_s8 }
 0xa4b   :  { %p2056_p7 = pnand %p2054_p6, %p2051_p5 }
 0xa4d   :  { %2059 = shalt.err (!%p2056_p7)
}
 0xa4e   :  { %1507 = dma.vmem_to_hbm [thread:$0]  %s1505_s14, 32, %s2751_s8, [#allocation3]  }
 0xa4f   :  { %2060 = dma.done.wait [#allocation3], 32  }
 0xa50   :  { %2061 = vsyncadd [#allocation3], 4294967264 }
 0xa51   :  { %1511 = vsyncpa [#allocation3], 1 }

</bundles_post_ra>
